<compile_context>
chip_gen: v5e
topology: v5e:2x2
jax: 0.10.0
libtpu: 0.0.40
codegen_flags: <defaults>
</compile_context>

<pallas_src>
import functools

import jax
import jax.numpy as jnp
import numpy as np
from jax.experimental import pallas as pl
from jax.experimental.pallas import tpu as pltpu


def _arfmhsa_kernel(x_ref, wq_ref, wk_ref, wv_ref, bq_ref, bk_ref, bv_ref,
                    pos_ref, o_ref, *, fm_sz: int, pos_bias: bool):
    C = wq_ref.shape[0]          # head_n * out_c (all heads fused)
    F = fm_sz

    x = x_ref[0]                 # (in_c, F*F)  lane-dense
    wq = wq_ref[...]             # (C, in_c)
    wk = wk_ref[...]
    wv = wv_ref[...]

    # 1x1 conv over channels == channel matmul (+ bias); N = F*F is lane-dense.
    q = jnp.dot(wq, x, preferred_element_type=jnp.float32) + bq_ref[...]
    k = jnp.dot(wk, x, preferred_element_type=jnp.float32) + bk_ref[...]
    v = jnp.dot(wv, x, preferred_element_type=jnp.float32) + bv_ref[...]

    pos = pos_ref[...]           # (F, F), identical for every channel

    # Split q/k to (C, F, F) only for the per-channel q @ k^T contraction.
    q3 = q.reshape(C, F, F)
    k3 = k.reshape(C, F, F)

    if pos_bias:
        att = jnp.einsum('chw,cxw->chx', q3, k3,
                         preferred_element_type=jnp.float32) + pos
    else:
        # Exact fold: q @ k^T + q @ pos^T == q @ (k + pos)^T
        att = jnp.einsum('chw,cxw->chx', q3, k3 + pos,
                         preferred_element_type=jnp.float32)

    # Softmax over the flattened (F*F) map: single lane-reduce per row.
    att = att.reshape(C, F * F)
    m = jnp.max(att, axis=-1, keepdims=True)
    e = jnp.exp(att - m)
    s = jnp.sum(e, axis=-1, keepdims=True)
    att = e * pl.reciprocal(s, approx=False)   # exact reciprocal: keep 1e-4 tol

    # Lane-dense (C, F*F) store; v is already in the flattened layout.
    o_ref[0] = (att * v).astype(o_ref.dtype)


def arfmhsa_forward(x, wq, wk, wv, bq, bk, bv, pos2d, *, pos_bias=False):
    """x: (B, in_c, F, F); wq/wk/wv: (head_n, out_c, in_c);
    bq/bk/bv: (head_n, out_c); pos2d: (F, F).
    Returns (B, head_n*out_c, F, F), heads concatenated on channels."""
    B, in_c, F, _ = x.shape
    head_n, out_c, _ = wq.shape
    C = head_n * out_c

    # Flatten spatial outside the kernel; stack all heads on the channel axis
    # (matches the PyTorch concat order: head h -> channels [h*out_c, (h+1)*out_c)).
    x_flat = x.reshape(B, in_c, F * F)
    wq_all = wq.reshape(C, in_c)
    wk_all = wk.reshape(C, in_c)
    wv_all = wv.reshape(C, in_c)
    bq_all = bq.reshape(C, 1)
    bk_all = bk.reshape(C, 1)
    bv_all = bv.reshape(C, 1)

    kernel = functools.partial(_arfmhsa_kernel, fm_sz=F, pos_bias=pos_bias)

    grid_spec = pltpu.PrefetchScalarGridSpec(
        num_scalar_prefetch=0,
        grid=(B,),
        in_specs=[
            pl.BlockSpec((1, in_c, F * F), lambda b: (b, 0, 0)),   # x (per batch)
            pl.BlockSpec((C, in_c), lambda b: (0, 0)),             # wq (resident)
            pl.BlockSpec((C, in_c), lambda b: (0, 0)),             # wk
            pl.BlockSpec((C, in_c), lambda b: (0, 0)),             # wv
            pl.BlockSpec((C, 1), lambda b: (0, 0)),                # bq
            pl.BlockSpec((C, 1), lambda b: (0, 0)),                # bk
            pl.BlockSpec((C, 1), lambda b: (0, 0)),                # bv
            pl.BlockSpec((F, F), lambda b: (0, 0)),                # pos (2D map)
        ],
        out_specs=pl.BlockSpec((1, C, F * F), lambda b: (b, 0, 0)),
    )

    out_flat = pl.pallas_call(
        kernel,
        out_shape=jax.ShapeDtypeStruct((B, C, F * F), x.dtype),
        grid_spec=grid_spec,
        compiler_params=pltpu.CompilerParams(
            dimension_semantics=("parallel",)),
    )(x_flat, wq_all, wk_all, wv_all, bq_all, bk_all, bv_all, pos2d)

    return out_flat.reshape(B, C, F, F)


def make_pos_code(fm_sz):
    """Replicates ARFSA.__getPosCode as the underlying 2D map (it is identical
    for every output channel, so we only materialize (F, F))."""
    vals = np.array(
        [[np.sin, np.cos][i % 2](1.0 / 10000 ** (i // 2 / fm_sz))
         for i in range(fm_sz)],
        dtype=np.float64)
    row = vals[None, :]                       # (1, fm_sz)
    pos2d = (row + row.T).astype(np.float32)  # (fm_sz, fm_sz)
    return jnp.asarray(pos2d)


def ref_forward(x, wq, wk, wv, bq, bk, bv, pos_code, *, pos_bias=False):
    """Plain-JAX reference mirroring the PyTorch forward.
    pos_code: (out_c, F, F)."""
    head_n = wq.shape[0]
    outs = []
    for h in range(head_n):
        q = jnp.einsum('oi,bihw->bohw', wq[h], x) + bq[h][None, :, None, None]
        k = jnp.einsum('oi,bihw->bohw', wk[h], x) + bk[h][None, :, None, None]
        v = jnp.einsum('oi,bihw->bohw', wv[h], x) + bv[h][None, :, None, None]
        att = jnp.einsum('bchw,bcxw->bchx', q, k)
        if pos_bias:
            att = att + pos_code[None]
        else:
            att = att + jnp.einsum('bchw,cxw->bchx', q, pos_code)
        B, C, H, W = att.shape
        att = jax.nn.softmax(att.reshape(B, C, H * W), axis=2).reshape(B, C, H, W)
        outs.append(att * v)
    return jnp.concatenate(outs, axis=1)


if __name__ == "__main__":
    B, in_c, out_c, head_n, fm_sz = 2, 4, 8, 2, 16
    pos_bias = False

    key = jax.random.PRNGKey(0)
    k_x, k_wq, k_wk, k_wv, k_bq, k_bk, k_bv = jax.random.split(key, 7)

    x = jax.random.normal(k_x, (B, in_c, fm_sz, fm_sz), dtype=jnp.float32)
    wq = jax.random.normal(k_wq, (head_n, out_c, in_c), dtype=jnp.float32) * 0.2
    wk = jax.random.normal(k_wk, (head_n, out_c, in_c), dtype=jnp.float32) * 0.2
    wv = jax.random.normal(k_wv, (head_n, out_c, in_c), dtype=jnp.float32) * 0.2
    bq = jax.random.normal(k_bq, (head_n, out_c), dtype=jnp.float32) * 0.1
    bk = jax.random.normal(k_bk, (head_n, out_c), dtype=jnp.float32) * 0.1
    bv = jax.random.normal(k_bv, (head_n, out_c), dtype=jnp.float32) * 0.1

    pos2d = make_pos_code(fm_sz)
    pos_full = jnp.broadcast_to(pos2d, (out_c, fm_sz, fm_sz))  # for the reference

    out = arfmhsa_forward(x, wq, wk, wv, bq, bk, bv, pos2d, pos_bias=pos_bias)
    out = jax.block_until_ready(out)

    ref = ref_forward(x, wq, wk, wv, bq, bk, bv, pos_full, pos_bias=pos_bias)
    assert out.shape == (B, head_n * out_c, fm_sz, fm_sz)
    np.testing.assert_allclose(np.asarray(out), np.asarray(ref),
                               rtol=1e-4, atol=1e-4)
    print("KERNEL_OK")
</pallas_src>

<mosaic_0001>
module attributes {stable_mosaic.version = 11 : i64} {
  func.func @_arfmhsa_kernel(%arg0: i32, %arg1: memref<1x4x256xf32, #tpu.memory_space<vmem>>, %arg2: memref<16x4xf32, #tpu.memory_space<vmem>>, %arg3: memref<16x4xf32, #tpu.memory_space<vmem>>, %arg4: memref<16x4xf32, #tpu.memory_space<vmem>>, %arg5: memref<16x1xf32, #tpu.memory_space<vmem>>, %arg6: memref<16x1xf32, #tpu.memory_space<vmem>>, %arg7: memref<16x1xf32, #tpu.memory_space<vmem>>, %arg8: memref<16x16xf32, #tpu.memory_space<vmem>>, %arg9: memref<1x16x256xf32, #tpu.memory_space<vmem>>) attributes {dimension_semantics = [#tpu.dimension_semantics<parallel>], iteration_bounds = array<i64: 2>, scalar_prefetch = 0 : i64, scratch_operands = 0 : i64, tpu.core_type = #tpu.core_type<tc>, window_params = [{transform_indices = @transform_0, window_bounds = array<i64: 1, 4, 256>}, {pipeline_mode = #tpu.pipeline_mode<synchronous>, transform_indices = @transform_1, window_bounds = array<i64: 16, 4>}, {pipeline_mode = #tpu.pipeline_mode<synchronous>, transform_indices = @transform_2, window_bounds = array<i64: 16, 4>}, {pipeline_mode = #tpu.pipeline_mode<synchronous>, transform_indices = @transform_3, window_bounds = array<i64: 16, 4>}, {pipeline_mode = #tpu.pipeline_mode<synchronous>, transform_indices = @transform_4, window_bounds = array<i64: 16, 1>}, {pipeline_mode = #tpu.pipeline_mode<synchronous>, transform_indices = @transform_5, window_bounds = array<i64: 16, 1>}, {pipeline_mode = #tpu.pipeline_mode<synchronous>, transform_indices = @transform_6, window_bounds = array<i64: 16, 1>}, {pipeline_mode = #tpu.pipeline_mode<synchronous>, transform_indices = @transform_7, window_bounds = array<i64: 16, 16>}, {transform_indices = @transform_8, window_bounds = array<i64: 1, 16, 256>}]} {
    %c0 = arith.constant 0 : index
    %c0_0 = arith.constant 0 : index
    %c0_1 = arith.constant 0 : index
    %0 = vector.load %arg1[%c0, %c0_0, %c0_1] : memref<1x4x256xf32, #tpu.memory_space<vmem>>, vector<1x4x256xf32>
    %1 = vector.shape_cast %0 : vector<1x4x256xf32> to vector<4x256xf32>
    %c0_2 = arith.constant 0 : index
    %c0_3 = arith.constant 0 : index
    %2 = vector.load %arg2[%c0_2, %c0_3] : memref<16x4xf32, #tpu.memory_space<vmem>>, vector<16x4xf32>
    %c0_4 = arith.constant 0 : index
    %c0_5 = arith.constant 0 : index
    %3 = vector.load %arg3[%c0_4, %c0_5] : memref<16x4xf32, #tpu.memory_space<vmem>>, vector<16x4xf32>
    %c0_6 = arith.constant 0 : index
    %c0_7 = arith.constant 0 : index
    %4 = vector.load %arg4[%c0_6, %c0_7] : memref<16x4xf32, #tpu.memory_space<vmem>>, vector<16x4xf32>
    %cst = arith.constant dense<0.000000e+00> : vector<16x256xf32>
    %5 = tpu.matmul %2, %1, %cst {dimension_numbers = #tpu.dot_dimension_numbers<[1], [0], [0], [1], [0, 0, 1, 1], [], []>} : vector<16x4xf32>, vector<4x256xf32>, vector<16x256xf32> -> vector<16x256xf32>
    %c0_8 = arith.constant 0 : index
    %c0_9 = arith.constant 0 : index
    %6 = vector.load %arg5[%c0_8, %c0_9] : memref<16x1xf32, #tpu.memory_space<vmem>>, vector<16x1xf32>
    %7 = vector.broadcast %6 : vector<16x1xf32> to vector<16x256xf32>
    %8 = arith.addf %5, %7 : vector<16x256xf32>
    %cst_10 = arith.constant dense<0.000000e+00> : vector<16x256xf32>
    %9 = tpu.matmul %3, %1, %cst_10 {dimension_numbers = #tpu.dot_dimension_numbers<[1], [0], [0], [1], [0, 0, 1, 1], [], []>} : vector<16x4xf32>, vector<4x256xf32>, vector<16x256xf32> -> vector<16x256xf32>
    %c0_11 = arith.constant 0 : index
    %c0_12 = arith.constant 0 : index
    %10 = vector.load %arg6[%c0_11, %c0_12] : memref<16x1xf32, #tpu.memory_space<vmem>>, vector<16x1xf32>
    %11 = vector.broadcast %10 : vector<16x1xf32> to vector<16x256xf32>
    %12 = arith.addf %9, %11 : vector<16x256xf32>
    %cst_13 = arith.constant dense<0.000000e+00> : vector<16x256xf32>
    %13 = tpu.matmul %4, %1, %cst_13 {dimension_numbers = #tpu.dot_dimension_numbers<[1], [0], [0], [1], [0, 0, 1, 1], [], []>} : vector<16x4xf32>, vector<4x256xf32>, vector<16x256xf32> -> vector<16x256xf32>
    %c0_14 = arith.constant 0 : index
    %c0_15 = arith.constant 0 : index
    %14 = vector.load %arg7[%c0_14, %c0_15] : memref<16x1xf32, #tpu.memory_space<vmem>>, vector<16x1xf32>
    %15 = vector.broadcast %14 : vector<16x1xf32> to vector<16x256xf32>
    %16 = arith.addf %13, %15 : vector<16x256xf32>
    %c0_16 = arith.constant 0 : index
    %c0_17 = arith.constant 0 : index
    %17 = vector.load %arg8[%c0_16, %c0_17] : memref<16x16xf32, #tpu.memory_space<vmem>>, vector<16x16xf32>
    %18 = vector.shape_cast %8 : vector<16x256xf32> to vector<16x16x16xf32>
    %19 = vector.shape_cast %12 : vector<16x256xf32> to vector<16x16x16xf32>
    %20 = vector.shape_cast %17 : vector<16x16xf32> to vector<1x16x16xf32>
    %21 = vector.broadcast %20 : vector<1x16x16xf32> to vector<16x16x16xf32>
    %22 = arith.addf %19, %21 : vector<16x16x16xf32>
    "tpu.trace_start"() <{level = 10 : i32, message = "chw,cxw->chx"}> : () -> ()
    %cst_18 = arith.constant dense<0.000000e+00> : vector<16x16x16xf32>
    %23 = tpu.matmul %18, %22, %cst_18 {dimension_numbers = #tpu.dot_dimension_numbers<[2], [2], [1], [1], [0, 0, 0, 1, 1, 1], [0], [0]>} : vector<16x16x16xf32>, vector<16x16x16xf32>, vector<16x16x16xf32> -> vector<16x16x16xf32>
    "tpu.trace_stop"() : () -> ()
    %24 = vector.shape_cast %23 : vector<16x16x16xf32> to vector<16x256xf32>
    %cst_19 = arith.constant dense<0xFF800000> : vector<16xf32>
    %25 = vector.multi_reduction <maximumf>, %24, %cst_19 [1] : vector<16x256xf32> to vector<16xf32>
    %26 = vector.shape_cast %25 : vector<16xf32> to vector<16x1xf32>
    %27 = vector.broadcast %26 : vector<16x1xf32> to vector<16x256xf32>
    %28 = arith.subf %24, %27 : vector<16x256xf32>
    %29 = math.exp %28 : vector<16x256xf32>
    %cst_20 = arith.constant dense<0.000000e+00> : vector<16xf32>
    %30 = vector.multi_reduction <add>, %29, %cst_20 [1] : vector<16x256xf32> to vector<16xf32>
    %31 = vector.shape_cast %30 : vector<16xf32> to vector<16x1xf32>
    %32 = tpu.reciprocal %31 : vector<16x1xf32> -> vector<16x1xf32>
    %33 = vector.broadcast %32 : vector<16x1xf32> to vector<16x256xf32>
    %34 = arith.mulf %29, %33 : vector<16x256xf32>
    %35 = arith.mulf %34, %16 : vector<16x256xf32>
    %c0_21 = arith.constant 0 : index
    %c0_22 = arith.constant 0 : index
    %c0_23 = arith.constant 0 : index
    %36 = vector.load %arg9[%c0_21, %c0_22, %c0_23] : memref<1x16x256xf32, #tpu.memory_space<vmem>>, vector<1x16x256xf32>
    %37 = vector.shape_cast %36 : vector<1x16x256xf32> to vector<16x256xf32>
    %38 = vector.shape_cast %35 : vector<16x256xf32> to vector<1x16x256xf32>
    tpu.vector_store %arg9[%c0_21, %c0_22, %c0_23], %38 {strides = array<i32>} : memref<1x16x256xf32, #tpu.memory_space<vmem>>, vector<1x16x256xf32>,
    return
  }
  func.func @transform_0(%arg0: i32) -> (i32, i32, i32) {
    %c0_i32 = arith.constant 0 : i32
    %c0_i32_0 = arith.constant 0 : i32
    %c0_i32_1 = arith.constant 0 : i32
    return %arg0, %c0_i32, %c0_i32_0 : i32, i32, i32
  }
  func.func @transform_1(%arg0: i32) -> (i32, i32) {
    %c0_i32 = arith.constant 0 : i32
    %c0_i32_0 = arith.constant 0 : i32
    %c0_i32_1 = arith.constant 0 : i32
    return %c0_i32, %c0_i32_0 : i32, i32
  }
  func.func @transform_2(%arg0: i32) -> (i32, i32) {
    %c0_i32 = arith.constant 0 : i32
    %c0_i32_0 = arith.constant 0 : i32
    %c0_i32_1 = arith.constant 0 : i32
    return %c0_i32, %c0_i32_0 : i32, i32
  }
  func.func @transform_3(%arg0: i32) -> (i32, i32) {
    %c0_i32 = arith.constant 0 : i32
    %c0_i32_0 = arith.constant 0 : i32
    %c0_i32_1 = arith.constant 0 : i32
    return %c0_i32, %c0_i32_0 : i32, i32
  }
  func.func @transform_4(%arg0: i32) -> (i32, i32) {
    %c0_i32 = arith.constant 0 : i32
    %c0_i32_0 = arith.constant 0 : i32
    %c0_i32_1 = arith.constant 0 : i32
    return %c0_i32, %c0_i32_0 : i32, i32
  }
  func.func @transform_5(%arg0: i32) -> (i32, i32) {
    %c0_i32 = arith.constant 0 : i32
    %c0_i32_0 = arith.constant 0 : i32
    %c0_i32_1 = arith.constant 0 : i32
    return %c0_i32, %c0_i32_0 : i32, i32
  }
  func.func @transform_6(%arg0: i32) -> (i32, i32) {
    %c0_i32 = arith.constant 0 : i32
    %c0_i32_0 = arith.constant 0 : i32
    %c0_i32_1 = arith.constant 0 : i32
    return %c0_i32, %c0_i32_0 : i32, i32
  }
  func.func @transform_7(%arg0: i32) -> (i32, i32) {
    %c0_i32 = arith.constant 0 : i32
    %c0_i32_0 = arith.constant 0 : i32
    %c0_i32_1 = arith.constant 0 : i32
    return %c0_i32, %c0_i32_0 : i32, i32
  }
  func.func @transform_8(%arg0: i32) -> (i32, i32, i32) {
    %c0_i32 = arith.constant 0 : i32
    %c0_i32_0 = arith.constant 0 : i32
    %c0_i32_1 = arith.constant 0 : i32
    return %arg0, %c0_i32, %c0_i32_0 : i32, i32, i32
  }
}

</mosaic_0001>

<bundles_post_ra>
// kernel: tpu_custom_call.1
= control target key start
LH: loop header
LB: loop body
LE: loop exit
PB: predicated region body
PF: predicated region fallthrough
CT: control target
= control target key end

     0   :  { %13 = vsyncpa [#allocation3], 0  ;;  %s4508_s0 = inlined_call_operand.vmem [shape: f32[2,4,256], index: 0, kind: input, shape index: {}]   ;;  %s4509_s1 = inlined_call_operand.vmem [shape: f32[16,4], index: 1, kind: input, shape index: {}]   ;;  %s4510_s2 = inlined_call_operand.vmem [shape: f32[16,4], index: 2, kind: input, shape index: {}]   ;;  %s4511_s3 = inlined_call_operand.vmem [shape: f32[16,4], index: 3, kind: input, shape index: {}]   ;;  %s4512_s4 = inlined_call_operand.vmem [shape: f32[16,1], index: 4, kind: input, shape index: {}]   ;;  %s4513_s5 = inlined_call_operand.vmem [shape: f32[16,1], index: 5, kind: input, shape index: {}]   ;;  %s4514_s6 = inlined_call_operand.vmem [shape: f32[16,1], index: 6, kind: input, shape index: {}]   ;;  %s4515_s7 = inlined_call_operand.vmem [shape: f32[16,16], index: 7, kind: input, shape index: {}]   ;;  %s4516_s8 = inlined_call_operand.hbm [shape: f32[2,16,256], index: 8, kind: output, shape index: {}]  }
   0x1   :  { %15 = vsyncpa [#allocation3 + $0x1], 0  ;;  %s3214_s27 = smov 0   ;;  %s3216_s28 = smov 0  }
   0x2   :  { %s3218_s29 = smov 0   ;;  %s3220_s30 = smov 0  }
   0x3 LB: > { %s3235_s9 = sadd.s32 4294967295, %s3156_s30   ;;  %s2931_s10 = sadd.s32 4294967294, %s3156_s30   ;;  %s3156_s30 = sphi %s3220_s30, %s4534_s30   ;;  %s3152_s29 = sphi %s3218_s29, %s4533_s29   ;;  %s3148_s28 = sphi %s3216_s28, %s4532_s28   ;;  %s3144_s27 = sphi %s3214_s27, %s4531_s27  }
   0x4   : > { %s3239_s11 = sadd.s32 1, %s3156_s30   ;;  %s201_s12 = sadd.s32 1, %s3152_s29 }
   0x5   : > { %s198_s13 = ssub.s32 %s3156_s30, %s3239_s11  ;;  %p211_p0 = scmp.ne.s32.totalorder %s3152_s29, %s3148_s28 }
   0x6   : > { %p199_p1 = scmp.eq.s32.totalorder %s198_s13, 0  ;;  %p212_p2 = scmp.eq.s32.totalorder %s3235_s9, 1 }
   0x7   : > { %p217_p3 = scmp.ne.s32.totalorder %s3148_s28, %s3144_s27  ;;  %p218_p4 = scmp.eq.s32.totalorder %s2931_s10, 1 }
   0x8   : > { %s3250_s14 = scalar_select %p199_p1, %s3152_s29, %s201_s12  }
   0x9   : > { %p3252_p5 = por %p212_p2, %p211_p0  ;;  %p3256_p6 = por %p218_p4, %p217_p3 }
   0xa   : > { %p2934_p7 = scmp.ge.s32.totalorder %s3156_s30, 1  ;;  %p265_p8 = scmp.lt.s32.totalorder %s3156_s30, 3 }
   0xc   : > { %p266_p9 = pnand %p2934_p7, %p265_p8 }
   0xe   : > { %269 = sbr.rel (%p266_p9) target bundleno = 1005 (0x3ed), region = 52 }
  0x13   : > { %v385_v0 = vld [vmem:[%s4513_s5] sm:$0xff]  ;;  %p299_p10 = scmp.lt.s32.totalorder %s3235_s9, 1  ;;  %v3158_v1 = vmov 0   ;;  %v386_v2 = vld [vmem:[%s4513_s5 + $0x8] sm:$0xff]  ;;  %vm334_vm0 = vcmask 1043456   ;;  %vm327_vm1 = vcmask 31744  }
  0x14   : > { %3079 = vset.pattern.permute.xlu0 %v3158_v1  ;;  %3080 = vset.pattern.permute.xlu1 %v3158_v1  ;;  %v311_v4 = vld [vmem:[%s4512_s4] sm:$0xff]  ;;  %v312_v5 = vld [vmem:[%s4512_s4 + $0x8] sm:$0xff]  ;;  %s3160_s26 = smov 16   ;;  %s3161_s10 = smov 80   ;;  %vm618_vm2 = vcmask 1047556   ;;  %vm1634_vm3 = vcmask 130048  }
  0x15   : > { %389 = vperm.xlu0 %3079, %v385_v0   ;;  %s300_s19 = scalar_select %p299_p10, %s3235_s9, 1  ;;  %3081 = vset.pattern.permute.xlu2 %v3158_v1  ;;  %v305_v6 = vld [vmem:[%s4509_s1] sm:$0xff]  ;;  %v306_v7 = vld [vmem:[%s4509_s1 + $0x8] sm:$0xff]  ;;  %v3166_v38 = vmov 1983009808   ;;  %vm2757_vm4 = vcmask 261120  }
  0x16   : > { %394 = vperm.xlu1 %3080, %v386_v2   ;;  %v307_v10 = vld [vmem:[%s4510_s2] sm:$0xff]  ;;  %v308_v13 = vld [vmem:[%s4510_s2 + $0x8] sm:$0xff]  ;;  %s3162_s12 = smov 32   ;;  %s3163_s13 = smov 48   ;;  %v623_v39 = vunpack.c.l.s4 %v3166_v38  ;;  %v3167_v60 = vmov 1934713408  }
  0x17   : > { %s3025_s22 = sshll.u32 %s300_s19, 3  ;;  %s3164_s17 = smov 96   ;;  %v671_v61 = vunpack.c.l.s4 %v3167_v60  ;;  %vm2760_vm5 = vcmask 392192   ;;  %vm2763_vm6 = vcmask 523264   ;;  %vm2766_vm7 = vcmask 654336  }
  0x18   : > { %s303_s25 = scalar_lea.vmem %s4508_s0, %s3025_s22  ;;  %s3165_s18 = smov 64   ;;  %v3417_v48 = vunpack.c.0.s8 %v623_v39  ;;  %vm2769_vm8 = vcmask 785408   ;;  %vm2772_vm9 = vcmask 916480  }
  0x19   : > { %v304_v3 = vld [vmem:[%s303_s25] sm:$0xff]  ;;  %s3159_s25 = smov 112   ;;  %s3026_s22 = sshll.u32 %s3235_s9, 5 }
  0x1a   : > { %324 = vst [vmem:[#allocation1] ss:$2 sm:$0xff] %v304_v3  ;;  %s2865_s19 = scalar_lea.hbm %s4516_s8, %s3026_s22  ;;  %s3114_s22 = scalar_lea.hbm %s4516_s8, 64 }
  0x1b   : > { %s2868_s9 = sshll.u32 %s2865_s19, 4  ;;  %s2869_s9 = int_to_ptr.hbm [resolvable:$true] %s2868_s9 }
  0x1d   : > { %315 = vperm.xlu0 %3079, %v311_v4  }
  0x1e   : > { %320 = vperm.xlu1 %3080, %v312_v5  }
  0x21   : > { %v325_v8 = vld.sshfl [vmem:[#allocation1] sm:$0xff pattern:$0x75316420]  ;;  %v326_v9 = vld.sshfl [vmem:[#allocation1 + $0x8] sm:$0xff pattern:$0x75316420] }
  0x22   : > { %2938 = vmatpush.msk.msra.mxu0 %vm334_vm0, %v325_v8  ;;  %3027 = vmatpush.msk.msra.mxu2 %vm334_vm0, %v325_v8  ;;  %397 = vst [vmem:[#allocation1] ss:$2 sm:$0xff] %v304_v3 }
  0x23   : > { %2941 = vmatpush.msk.msra.mxu1 %vm334_vm0, %v326_v9  ;;  %3028 = vmatpush.msk.msra.mxu3 %vm334_vm0, %v326_v9  ;;  %v3440_v9 = vunpack.c.0.s8 %v671_v61 }
  0x24   : > { %2939 = vmatmul.msk.f32.vlgmr.msra.gmra.mxu0 %vm327_vm1, %v305_v6  ;;  %2940 = vmatmul.msk.f32.vlgmr.msra.gmra.mxu2 %vm327_vm1, %v306_v7 }
  0x25   : > { %2942 = vmatmul.msk.f32.vlgmr.msra.gmra.mxu1 %vm327_vm1, %v305_v6  ;;  %2943 = vmatmul.msk.f32.vlgmr.msra.gmra.mxu3 %vm327_vm1, %v306_v7 }
  0x29   : > { %v398_v11 = vld.sshfl [vmem:[#allocation1] sm:$0xff pattern:$0x75316420]  ;;  %v399_v12 = vld.sshfl [vmem:[#allocation1 + $0x8] sm:$0xff pattern:$0x75316420] }
  0x2a   : > { %2944 = vmatpush.msk.msrb.mxu2 %vm334_vm0, %v398_v11  ;;  %2947 = vmatpush.msk.msrb.mxu3 %vm334_vm0, %v399_v12  ;;  %468 = vst [vmem:[#allocation1] ss:$2 sm:$0xff] %v304_v3 }
  0x2c   : > { %2945 = vmatmul.msk.f32.vlgmr.msrb.gmra.mxu2 %vm327_vm1, %v307_v10 }
  0x2d   : > { %2948 = vmatmul.msk.f32.vlgmr.msrb.gmra.mxu3 %vm327_vm1, %v307_v10 }
  0x34   : > { %2946 = vmatmul.msk.f32.gmra.mxu2 %vm327_vm1, %v308_v13 }
  0x35   : > { %2949 = vmatmul.msk.f32.gmra.mxu3 %vm327_vm1, %v308_v13 }
  0x87   : > { %v390_v14 = vpop.permute.xlu0 %389 }
  0x88   : > { %v395_v20 = vpop.permute.xlu1 %394 }
  0x8f   : > { %v316_v15 = vpop.permute.xlu0 %315 }
  0x90   : > { %v321_v21 = vpop.permute.xlu1 %320 }
  0xa1   : > { %v356_v16 = vpop.f32.mrf.mxu0 }
  0xa2   : > { %v3305_v17 = vadd.f32 %v356_v16, %v316_v15  ;;  %v379_v18 = vpop.f32.mrf.mxu1 }
  0xa3   : > { %v3319_v19 = vadd.f32 %v379_v18, %v316_v15 }
  0xa4   : > { %531 = vrot.lane.b32.xlu2 %v3305_v17, %s3159_s25  ;;  %567 = vrot.lane.b32.xlu1 %v3305_v17, %s3160_s26  ;;  %v620_v55 = vrot.slane %v3305_v17, 4 }
  0xa5   : > { %543 = vrot.lane.b32.xlu0 %v3305_v17, %s3161_s10  ;;  %v732_v39 = vrot.slane %v3319_v19, 4 }
  0xa7   : > { %v359_v22 = vpop.f32.mrf.mxu2 }
  0xa8   : > { %v3333_v23 = vadd.f32 %v359_v22, %v321_v21  ;;  %v382_v24 = vpop.f32.mrf.mxu3 }
  0xa9   : > { %v3347_v25 = vadd.f32 %v382_v24, %v321_v21 }
  0xac   : > { %561 = vrot.lane.b32.xlu2 %v3305_v17, %s3162_s12  ;;  %555 = vrot.lane.b32.xlu1 %v3305_v17, %s3163_s13 }
  0xad   : > { %537 = vrot.lane.b32.xlu0 %v3305_v17, %s3164_s17 }
  0xaf   : > { %v427_v28 = vpop.f32.mrf.mxu2 }
  0xb0   : > { %v450_v26 = vpop.f32.mrf.mxu3  ;;  %v3369_v29 = vadd.f32 %v427_v28, %v390_v14 }
  0xb1   : > { %v3355_v27 = vadd.f32 %v450_v26, %v390_v14 }
  0xb4   : > { %611 = vrot.lane.b32.xlu2 %v3319_v19, %s3160_s26  ;;  %587 = vrot.lane.b32.xlu1 %v3319_v19, %s3161_s10 }
  0xb5   : > { %549 = vrot.lane.b32.xlu0 %v3305_v17, %s3165_s18 }
  0xb7   : > { %v430_v34 = vpop.f32.mrf.mxu2 }
  0xb8   : > { %v453_v30 = vpop.f32.mrf.mxu3  ;;  %v3399_v35 = vadd.f32 %v430_v34, %v395_v20 }
  0xb9   : > { %v3383_v31 = vadd.f32 %v453_v30, %v395_v20 }
  0xbc   : > { %599 = vrot.lane.b32.xlu2 %v3319_v19, %s3163_s13  ;;  %581 = vrot.lane.b32.xlu1 %v3319_v19, %s3164_s17 }
  0xbd   : > { %575 = vrot.lane.b32.xlu0 %v3319_v19, %s3159_s25 }
  0xc4   : > { %569 = vrot.lane.b32.xlu2 %v3333_v23, %s3160_s26  ;;  %593 = vrot.lane.b32.xlu1 %v3319_v19, %s3165_s18 }
  0xc5   : > { %605 = vrot.lane.b32.xlu0 %v3319_v19, %s3162_s12 }
  0xcc   : > { %557 = vrot.lane.b32.xlu2 %v3333_v23, %s3163_s13  ;;  %545 = vrot.lane.b32.xlu1 %v3333_v23, %s3161_s10 }
  0xcd   : > { %533 = vrot.lane.b32.xlu0 %v3333_v23, %s3159_s25 }
  0xd4   : > { %589 = vrot.lane.b32.xlu2 %v3347_v25, %s3161_s10  ;;  %539 = vrot.lane.b32.xlu1 %v3333_v23, %s3164_s17 }
  0xd5   : > { %563 = vrot.lane.b32.xlu0 %v3333_v23, %s3162_s12 }
  0xdc   : > { %1124 = vrot.lane.b32.xlu2 %v3355_v27, %s3161_s10  ;;  %551 = vrot.lane.b32.xlu1 %v3333_v23, %s3165_s18 }
  0xdd   : > { %1112 = vrot.lane.b32.xlu0 %v3355_v27, %s3159_s25 }
  0xe4   : > { %1148 = vrot.lane.b32.xlu2 %v3355_v27, %s3160_s26  ;;  %1118 = vrot.lane.b32.xlu1 %v3355_v27, %s3164_s17 }
  0xe5   : > { %1142 = vrot.lane.b32.xlu0 %v3355_v27, %s3162_s12 }
  0xec   : > { %1136 = vrot.lane.b32.xlu2 %v3355_v27, %s3163_s13  ;;  %1080 = vrot.lane.b32.xlu1 %v3369_v29, %s3161_s10 }
  0xed   : > { %1130 = vrot.lane.b32.xlu0 %v3355_v27, %s3165_s18 }
  0xf4   : > { %1104 = vrot.lane.b32.xlu2 %v3369_v29, %s3160_s26  ;;  %1068 = vrot.lane.b32.xlu1 %v3369_v29, %s3159_s25 }
  0xf5   : > { %1092 = vrot.lane.b32.xlu0 %v3369_v29, %s3163_s13 }
  0xfc   : > { %1074 = vrot.lane.b32.xlu2 %v3369_v29, %s3164_s17  ;;  %1098 = vrot.lane.b32.xlu1 %v3369_v29, %s3162_s12 }
  0xfd   : > { %1150 = vrot.lane.b32.xlu0 %v3383_v31, %s3160_s26 }
  0xfe   : > { %v532_v32 = vpop.permute.xlu2 %531 }
  0xff   : > { %v632_v40 = vrot.slane %v532_v32, 4 }
 0x104   : > { %1086 = vrot.lane.b32.xlu2 %v3369_v29, %s3165_s18  ;;  %1114 = vrot.lane.b32.xlu1 %v3383_v31, %s3159_s25 }
 0x105   : > { %1138 = vrot.lane.b32.xlu0 %v3383_v31, %s3163_s13 }
 0x106   : > { %v3397_v33 = vpop.permute.xlu2 %561 }
 0x107   : > { %v642_v14 = vrot.slane %v3397_v33, 4 }
 0x10c   : > { %1126 = vrot.lane.b32.xlu2 %v3383_v31, %s3161_s10  ;;  %1144 = vrot.lane.b32.xlu1 %v3383_v31, %s3162_s12 }
 0x10d   : > { %1106 = vrot.lane.b32.xlu0 %v3399_v35, %s3160_s26 }
 0x10e   : > { %v612_v36 = vpop.permute.xlu2 %611 }
 0x10f   : > { %v766_v37 = vrot.slane %v612_v36, 4 }
 0x114   : > { %1120 = vrot.lane.b32.xlu2 %v3383_v31, %s3164_s17  ;;  %1132 = vrot.lane.b32.xlu1 %v3383_v31, %s3165_s18 }
 0x115   : > { %1076 = vrot.lane.b32.xlu0 %v3399_v35, %s3164_s17 }
 0x116   : > { %v600_v41 = vpop.permute.xlu2 %599  ;;  %v568_v42 = vpop.permute.xlu1 %567 }
 0x117   : > { %v3414_v43 = vsel %vm618_vm2, %v766_v37, %v600_v41  ;;  %v768_v44 = vrot.slane %v600_v41, 4  ;;  %v544_v45 = vpop.permute.xlu0 %543  ;;  %v654_v51 = vrot.slane %v568_v42, 4 }
 0x118   : > { %v630_v46 = vrot.slane %v544_v45, 4  ;;  %v633_v47 = vsel %vm618_vm2, %v544_v45, %v632_v40 }
 0x119   : > { %v3420_v49 = vsel %vm618_vm2, %v612_v36, %v768_v44  ;;  %v641_v52 = vperm.slane %v633_v47, %v3417_v48 }
 0x11a   : > { %v631_v50 = vsel %vm618_vm2, %v630_v46, %v532_v32 }
 0x11b   : > { %v637_v56 = vperm.slane %v631_v50, %v3417_v48  ;;  %v678_v0 = vrot.slane %v641_v52, 4 }
 0x11c   : > { %1082 = vrot.lane.b32.xlu2 %v3399_v35, %s3161_s10  ;;  %1094 = vrot.lane.b32.xlu1 %v3399_v35, %s3163_s13 }
 0x11d   : > { %1088 = vrot.lane.b32.xlu0 %v3399_v35, %s3165_s18  ;;  %v666_v4 = vrot.slane %v637_v56, 4 }
 0x11e   : > { %v570_v53 = vpop.permute.xlu2 %569  ;;  %v556_v54 = vpop.permute.xlu1 %555 }
 0x11f   : > { %v655_v57 = vsel %vm618_vm2, %v654_v51, %v556_v54  ;;  %v656_v58 = vrot.slane %v556_v54, 4  ;;  %v538_v59 = vpop.permute.xlu0 %537  ;;  %v878_v8 = vrot.slane %v570_v53, 4 }
 0x120   : > { %v617_v62 = vrot.slane %v538_v59, 4  ;;  %v621_v63 = vsel %vm618_vm2, %v538_v59, %v620_v55  ;;  %v661_v10 = vperm.slane %v655_v57, %v3417_v48 }
 0x121   : > { %v657_v1 = vsel %vm618_vm2, %v568_v42, %v656_v58  ;;  %v629_v2 = vperm.slane %v621_v63, %v3417_v48 }
 0x122   : > { %v619_v3 = vsel %vm618_vm2, %v617_v62, %v3305_v17  ;;  %v665_v15 = vperm.slane %v657_v1, %v3417_v48  ;;  %v690_v32 = vrot.slane %v661_v10, 4 }
 0x123   : > { %v625_v5 = vperm.slane %v619_v3, %v3417_v48  ;;  %v679_v6 = vsel %vm618_vm2, %v678_v0, %v629_v2  ;;  %v680_v7 = vrot.slane %v629_v2, 4 }
 0x124   : > { %1070 = vrot.lane.b32.xlu2 %v3399_v35, %s3159_s25  ;;  %577 = vrot.lane.b32.xlu1 %v3347_v25, %s3159_s25  ;;  %v685_v24 = vperm.slane %v679_v6, %v3440_v9  ;;  %v702_v37 = vrot.slane %v665_v15, 4 }
 0x125   : > { %v667_v11 = vsel %vm618_vm2, %v666_v4, %v625_v5  ;;  %v668_v12 = vrot.slane %v625_v5, 4  ;;  %v681_v13 = vsel %vm618_vm2, %v641_v52, %v680_v7  ;;  %613 = vrot.lane.b32.xlu0 %v3347_v25, %s3160_s26 }
 0x126   : > { %v558_v16 = vpop.permute.xlu2 %557  ;;  %v588_v17 = vpop.permute.xlu1 %587  ;;  %v673_v30 = vperm.slane %v667_v11, %v3440_v9  ;;  %v689_v45 = vperm.slane %v681_v13, %v3440_v9  ;;  %v724_v47 = vrot.slane %v685_v24, 4 }
 0x127   : > { %v3454_v18 = vsel %vm618_vm2, %v878_v8, %v558_v16  ;;  %v880_v20 = vrot.slane %v558_v16, 4  ;;  %v550_v21 = vpop.permute.xlu0 %549  ;;  %v669_v22 = vsel %vm618_vm2, %v637_v56, %v668_v12  ;;  %v742_v50 = vrot.slane %v588_v17, 4 }
 0x128   : > { %v643_v26 = vsel %vm618_vm2, %v642_v14, %v550_v21  ;;  %v644_v28 = vrot.slane %v550_v21, 4  ;;  %v677_v44 = vperm.slane %v669_v22, %v3440_v9  ;;  %v728_v22 = vrot.slane %v689_v45, 4 }
 0x129   : > { %v3461_v34 = vsel %vm618_vm2, %v570_v53, %v880_v20  ;;  %v649_v36 = vperm.slane %v643_v26, %v3417_v48 }
 0x12a   : > { %v645_v38 = vsel %vm618_vm2, %v3397_v33, %v644_v28  ;;  %v716_v33 = vrot.slane %v673_v30, 4  ;;  %v720_v63 = vrot.slane %v677_v44, 4 }
 0x12b   : > { %v653_v40 = vperm.slane %v645_v38, %v3417_v48  ;;  %v691_v41 = vsel %vm618_vm2, %v690_v32, %v649_v36  ;;  %v692_v42 = vrot.slane %v649_v36, 4  ;;  %v777_v32 = vperm.slane %v3420_v49, %v3417_v48 }
 0x12c   : > { %v697_v46 = vperm.slane %v691_v41, %v3440_v9  ;;  %1100 = vrot.lane.b32.xlu2 %v3399_v35, %s3162_s12  ;;  %607 = vrot.lane.b32.xlu1 %v3347_v25, %s3162_s12  ;;  %v773_v41 = vperm.slane %v3414_v43, %v3417_v48 }
 0x12d   : > { %v693_v51 = vsel %vm618_vm2, %v661_v10, %v692_v42  ;;  %v704_v52 = vrot.slane %v653_v40, 4  ;;  %601 = vrot.lane.b32.xlu0 %v3347_v25, %s3163_s13  ;;  %v703_v53 = vsel %vm618_vm2, %v702_v37, %v653_v40 }
 0x12e   : > { %v3480_v54 = vpop.permute.xlu2 %589  ;;  %v582_v55 = vpop.permute.xlu1 %581  ;;  %v3483_v56 = vsel %vm618_vm2, %v697_v46, %v716_v33  ;;  %v714_v57 = vrot.slane %v697_v46, 4  ;;  %v701_v58 = vperm.slane %v693_v51, %v3440_v9  ;;  %v709_v59 = vperm.slane %v703_v53, %v3440_v9 }
 0x12f   : > { %v730_v60 = vrot.slane %v582_v55, 4  ;;  %v733_v61 = vsel %vm618_vm2, %v582_v55, %v732_v39  ;;  %v576_v62 = vpop.permute.xlu0 %575  ;;  %v705_v0 = vsel %vm618_vm2, %v665_v15, %v704_v52  ;;  %v802_v43 = vrot.slane %v773_v41, 4 }
 0x130   : > { %v741_v1 = vperm.slane %v733_v61, %v3417_v48  ;;  %v743_v2 = vsel %vm618_vm2, %v742_v50, %v576_v62  ;;  %v744_v3 = vrot.slane %v576_v62, 4  ;;  %v3492_v4 = vsel %vm618_vm2, %v714_v57, %v673_v30 }
 0x131   : > { %v731_v5 = vsel %vm618_vm2, %v730_v60, %v3319_v19  ;;  %v749_v6 = vperm.slane %v743_v2, %v3417_v48  ;;  %v3498_v7 = vsel %vm618_vm2, %v701_v58, %v720_v63  ;;  %v718_v8 = vrot.slane %v701_v58, 4 }
 0x132   : > { %v737_v10 = vperm.slane %v731_v5, %v3417_v48  ;;  %v792_v11 = vrot.slane %v741_v1, 4  ;;  %v745_v12 = vsel %vm618_vm2, %v588_v17, %v744_v3  ;;  %v3503_v13 = vsel %vm618_vm2, %v709_v59, %v724_v47 }
 0x133   : > { %v753_v14 = vperm.slane %v745_v12, %v3417_v48  ;;  %v778_v15 = vrot.slane %v749_v6, 4  ;;  %v3507_v16 = vsel %vm618_vm2, %v718_v8, %v677_v44  ;;  %v722_v19 = vrot.slane %v709_v59, 4 }
 0x134   : > { %v780_v20 = vrot.slane %v737_v10, 4  ;;  %583 = vrot.lane.b32.xlu2 %v3347_v25, %s3164_s17  ;;  %v713_v21 = vperm.slane %v705_v0, %v3440_v9  ;;  %v814_v50 = vrot.slane %v777_v32, 4 }
 0x135   : > { %v790_v26 = vrot.slane %v753_v14, 4  ;;  %v779_v17 = vsel %vm618_vm2, %v778_v15, %v737_v10  ;;  %v3514_v28 = vsel %vm618_vm2, %v722_v19, %v685_v24  ;;  %v793_v30 = vsel %vm618_vm2, %v753_v14, %v792_v11 }
 0x136   : > { %v781_v36 = vsel %vm618_vm2, %v749_v6, %v780_v20  ;;  %v3520_v37 = vpop.permute.xlu2 %1124  ;;  %v594_v38 = vpop.permute.xlu1 %593  ;;  %v3523_v39 = vsel %vm618_vm2, %v713_v21, %v728_v22  ;;  %v726_v40 = vrot.slane %v713_v21, 4  ;;  %v785_v53 = vperm.slane %v779_v17, %v3440_v9 }
 0x137   : > { %v756_v42 = vrot.slane %v594_v38, 4  ;;  %v606_v24 = vpop.permute.xlu0 %605  ;;  %v791_v44 = vsel %vm618_vm2, %v790_v26, %v741_v1  ;;  %v789_v57 = vperm.slane %v781_v36, %v3440_v9  ;;  %v801_v59 = vperm.slane %v793_v30, %v3440_v9 }
 0x138   : > { %v754_v46 = vrot.slane %v606_v24, 4  ;;  %v3529_v33 = vsel %vm618_vm2, %v726_v40, %v689_v45  ;;  %v797_v47 = vperm.slane %v791_v44, %v3440_v9  ;;  %v828_v3 = vrot.slane %v785_v53, 4 }
 0x139   : > { %v757_v49 = vsel %vm618_vm2, %v606_v24, %v756_v42  ;;  %v832_v11 = vrot.slane %v789_v57, 4  ;;  %v840_v17 = vrot.slane %v801_v59, 4  ;;  %v844_v44 = vrot.slane %v3333_v23, 4 }
 0x13a   : > { %v755_v51 = vsel %vm618_vm2, %v754_v46, %v594_v38  ;;  %v765_v52 = vperm.slane %v757_v49, %v3417_v48  ;;  %v836_v63 = vrot.slane %v797_v47, 4 }
 0x13b   : > { %v761_v55 = vperm.slane %v755_v51, %v3417_v48 }
 0x13c   : > { %v816_v58 = vrot.slane %v765_v52, 4  ;;  %595 = vrot.lane.b32.xlu2 %v3347_v25, %s3165_s18  ;;  %v815_v45 = vsel %vm618_vm2, %v814_v50, %v765_v52 }
 0x13d   : > { %v804_v60 = vrot.slane %v761_v55, 4  ;;  %v803_v61 = vsel %vm618_vm2, %v802_v43, %v761_v55  ;;  %v821_v62 = vperm.slane %v815_v45, %v3440_v9 }
 0x13e   : > { %v3544_v0 = vpop.permute.xlu2 %1148  ;;  %v546_v1 = vpop.permute.xlu1 %545  ;;  %v809_v2 = vperm.slane %v803_v61, %v3440_v9  ;;  %v817_v5 = vsel %vm618_vm2, %v777_v32, %v816_v58 }
 0x13f   : > { %v854_v6 = vrot.slane %v546_v1, 4  ;;  %v534_v8 = vpop.permute.xlu0 %533  ;;  %v805_v10 = vsel %vm618_vm2, %v773_v41, %v804_v60  ;;  %v3550_v12 = vsel %vm618_vm2, %v821_v62, %v836_v63  ;;  %v834_v22 = vrot.slane %v821_v62, 4  ;;  %v470_v63 = vld.sshfl [vmem:[#allocation1 + $0x8] sm:$0xff pattern:$0x75316420] }
 0x140   : > { %v856_v14 = vrot.slane %v534_v8, 4  ;;  %v3553_v15 = vsel %vm618_vm2, %v809_v2, %v828_v3  ;;  %v826_v19 = vrot.slane %v809_v2, 4  ;;  %v813_v20 = vperm.slane %v805_v10, %v3440_v9  ;;  %2953 = vmatpush.msk.msrb.mxu1 %vm334_vm0, %v470_v63 }
 0x141   : > { %v855_v21 = vsel %vm618_vm2, %v854_v6, %v534_v8  ;;  %v825_v26 = vperm.slane %v817_v5, %v3440_v9  ;;  %v3566_v40 = vsel %vm618_vm2, %v834_v22, %v797_v47  ;;  %v889_v3 = vperm.slane %v3461_v34, %v3417_v48 }
 0x142   : > { %v857_v30 = vsel %vm618_vm2, %v546_v1, %v856_v14  ;;  %v3560_v32 = vsel %vm618_vm2, %v826_v19, %v785_v53  ;;  %v3563_v36 = vsel %vm618_vm2, %v813_v20, %v832_v11  ;;  %v830_v38 = vrot.slane %v813_v20, 4 }
 0x143   : > { %v3569_v41 = vsel %vm618_vm2, %v825_v26, %v840_v17  ;;  %v865_v42 = vperm.slane %v857_v30, %v3417_v48  ;;  %v838_v24 = vrot.slane %v825_v26, 4  ;;  %v861_v49 = vperm.slane %v855_v21, %v3417_v48  ;;  %v469_v30 = vld.sshfl [vmem:[#allocation1] sm:$0xff pattern:$0x75316420] }
 0x144   : > { %v3574_v46 = vsel %vm618_vm2, %v830_v38, %v789_v57  ;;  %v926_v22 = vrot.slane %v889_v3, 4  ;;  %v1278_v34 = vrot.slane %v3520_v37, 4  ;;  %v1302_v26 = vrot.slane %v3544_v0, 4  ;;  %2950 = vmatpush.msk.msrb.mxu0 %vm334_vm0, %v469_v30 }
 0x145   : > { %v3580_v52 = vsel %vm618_vm2, %v838_v24, %v801_v59  ;;  %v902_v55 = vrot.slane %v865_v42, 4  ;;  %v890_v57 = vrot.slane %v861_v49, 4  ;;  %v885_v59 = vperm.slane %v3454_v18, %v3417_v48 }
 0x146   : > { %v3577_v50 = vpop.permute.xlu2 %1136  ;;  %v540_v51 = vpop.permute.xlu1 %539 }
 0x147   : > { %v842_v47 = vrot.slane %v540_v51, 4  ;;  %v845_v53 = vsel %vm618_vm2, %v540_v51, %v844_v44  ;;  %v564_v43 = vpop.permute.xlu0 %563  ;;  %v914_v20 = vrot.slane %v885_v59, 4  ;;  %v1304_v38 = vrot.slane %v3577_v50, 4 }
 0x148   : > { %v853_v58 = vperm.slane %v845_v53, %v3417_v48  ;;  %v866_v5 = vrot.slane %v564_v43, 4  ;;  %v1303_v63 = vsel %vm618_vm2, %v1302_v26, %v3577_v50 }
 0x149   : > { %v843_v45 = vsel %vm618_vm2, %v842_v47, %v3333_v23  ;;  %v1305_v50 = vsel %vm618_vm2, %v3544_v0, %v1304_v38  ;;  %v1309_v30 = vperm.slane %v1303_v63, %v3417_v48 }
 0x14a   : > { %v849_v60 = vperm.slane %v843_v45, %v3417_v48  ;;  %v903_v61 = vsel %vm618_vm2, %v902_v55, %v853_v58  ;;  %v904_v62 = vrot.slane %v853_v58, 4 }
 0x14c   : > { %v891_v1 = vsel %vm618_vm2, %v890_v57, %v849_v60  ;;  %v892_v2 = vrot.slane %v849_v60, 4  ;;  %v905_v23 = vsel %vm618_vm2, %v865_v42, %v904_v62  ;;  %v309_v57 = vld [vmem:[%s4511_s3] sm:$0xff] }
 0x14d   : > { %v897_v19 = vperm.slane %v891_v1, %v3440_v9  ;;  %2954 = vmatmul.msk.f32.vlgmr.msrb.gmra.mxu1 %vm327_vm1, %v309_v57  ;;  %2951 = vmatmul.msk.f32.vlgmr.msrb.gmra.mxu0 %vm327_vm1, %v309_v57 }
 0x14e   : > { %v3595_v6 = vpop.permute.xlu2 %1104  ;;  %v552_v8 = vpop.permute.xlu1 %551  ;;  %v893_v10 = vsel %vm618_vm2, %v861_v49, %v892_v2  ;;  %v909_v49 = vperm.slane %v903_v61, %v3440_v9 }
 0x14f   : > { %v867_v11 = vsel %vm618_vm2, %v866_v5, %v552_v8  ;;  %v868_v14 = vrot.slane %v552_v8, 4  ;;  %v1113_v18 = vpop.permute.xlu0 %1112  ;;  %v940_v47 = vrot.slane %v897_v19, 4  ;;  %v901_v53 = vperm.slane %v893_v10, %v3440_v9 }
 0x150   : > { %v873_v21 = vperm.slane %v867_v11, %v3417_v48  ;;  %v1279_v58 = vsel %vm618_vm2, %v1278_v34, %v1113_v18  ;;  %v1280_v1 = vrot.slane %v1113_v18, 4  ;;  %v1268_v18 = vrot.slane %v3355_v27, 4 }
 0x151   : > { %v869_v17 = vsel %vm618_vm2, %v564_v43, %v868_v14  ;;  %v3629_v8 = vperm.slane %v1279_v58, %v3417_v48  ;;  %v944_v14 = vrot.slane %v901_v53, 4  ;;  %v913_v34 = vperm.slane %v905_v23, %v3440_v9 }
 0x152   : > { %v877_v42 = vperm.slane %v869_v17, %v3417_v48  ;;  %v915_v24 = vsel %vm618_vm2, %v914_v20, %v873_v21  ;;  %v916_v44 = vrot.slane %v873_v21, 4  ;;  %v1281_v0 = vsel %vm618_vm2, %v3520_v37, %v1280_v1 }
 0x153   : > { %v921_v51 = vperm.slane %v915_v24, %v3440_v9  ;;  %v3657_v24 = vperm.slane %v1305_v50, %v3417_v48  ;;  %v1289_v58 = vperm.slane %v1281_v0, %v3417_v48  ;;  %v1338_v1 = vrot.slane %v1309_v30, 4 }
 0x154   : > { %v917_v55 = vsel %vm618_vm2, %v885_v59, %v916_v44  ;;  %v928_v43 = vrot.slane %v877_v42, 4  ;;  %v927_v45 = vsel %vm618_vm2, %v926_v22, %v877_v42  ;;  %v948_v22 = vrot.slane %v909_v49, 4 }
 0x155   : > { %v3618_v60 = vsel %vm618_vm2, %v921_v51, %v940_v47  ;;  %v938_v61 = vrot.slane %v921_v51, 4  ;;  %v925_v62 = vperm.slane %v917_v55, %v3440_v9  ;;  %v933_v20 = vperm.slane %v927_v45, %v3440_v9  ;;  %v310_v55 = vld [vmem:[%s4511_s3 + $0x8] sm:$0xff] }
 0x156   : > { %v3623_v59 = vpop.permute.xlu2 %1074  ;;  %v1119_v2 = vpop.permute.xlu1 %1118  ;;  %v929_v5 = vsel %vm618_vm2, %v889_v3, %v928_v43  ;;  %v1156_v44 = vrot.slane %v3369_v29, 4  ;;  %v952_v43 = vrot.slane %v913_v34, 4  ;;  %2955 = vmatmul.msk.f32.gmra.mxu1 %vm327_vm1, %v310_v55  ;;  %2952 = vmatmul.msk.f32.gmra.mxu0 %vm327_vm1, %v310_v55 }
 0x157   : > { %v1266_v10 = vrot.slane %v1119_v2, 4  ;;  %v1143_v11 = vpop.permute.xlu0 %1142  ;;  %v3636_v21 = vsel %vm618_vm2, %v938_v61, %v897_v19  ;;  %v3642_v26 = vsel %vm618_vm2, %v925_v62, %v944_v14  ;;  %v942_v17 = vrot.slane %v925_v62, 4 }
 0x158   : > { %v1314_v19 = vrot.slane %v3629_v8, 4  ;;  %v1269_v42 = vsel %vm618_vm2, %v1119_v2, %v1268_v18  ;;  %v946_v51 = vrot.slane %v933_v20, 4  ;;  %v1154_v37 = vrot.slane %v3623_v59, 4 }
 0x159   : > { %v1267_v3 = vsel %vm618_vm2, %v1266_v10, %v3355_v27  ;;  %v3651_v23 = vsel %vm618_vm2, %v942_v17, %v901_v53  ;;  %v3654_v27 = vsel %vm618_vm2, %v933_v20, %v948_v22  ;;  %v937_v53 = vperm.slane %v929_v5, %v3440_v9 }
 0x15a   : > { %v1273_v38 = vperm.slane %v1267_v3, %v3417_v48  ;;  %4519 = vst [vmem:[#allocation5_spill] sm:$0xff] %v3654_v27  ;;  %v1277_v45 = vperm.slane %v1269_v42, %v3417_v48  ;;  %v1290_v57 = vrot.slane %v1143_v11, 4  ;;  %v3673_v63 = vsel %vm618_vm2, %v946_v51, %v909_v49 }
 0x15b   : > { %4520 = vst [vmem:[#allocation6_spill] sm:$0xff] %v3673_v63  ;;  %v3681_v22 = vsel %vm618_vm2, %v937_v53, %v952_v43  ;;  %v1155_v49 = vsel %vm618_vm2, %v1154_v37, %v3369_v29  ;;  %v950_v0 = vrot.slane %v937_v53, 4  ;;  %v1326_v42 = vrot.slane %v1289_v58, 4 }
 0x15c   : > { %v1315_v47 = vsel %vm618_vm2, %v1314_v19, %v1273_v38  ;;  %4521 = vst [vmem:[#allocation7_spill] sm:$0xff] %v3681_v22  ;;  %v1316_v3 = vrot.slane %v1273_v38, 4  ;;  %v1350_v19 = vrot.slane %v3657_v24, 4  ;;  %v1328_v51 = vrot.slane %v1277_v45, 4 }
 0x15d   : > { %v1321_v20 = vperm.slane %v1315_v47, %v3440_v9  ;;  %v3691_v43 = vsel %vm618_vm2, %v950_v0, %v913_v34  ;;  %v1157_v29 = vsel %vm618_vm2, %v3623_v59, %v1156_v44  ;;  %v1161_v38 = vperm.slane %v1155_v49, %v3417_v48 }
 0x15e   : > { %v3668_v61 = vpop.permute.xlu2 %1086  ;;  %v1081_v62 = vpop.permute.xlu1 %1080  ;;  %4522 = vst [vmem:[#allocation8_spill] sm:$0xff] %v3691_v43 }
 0x15f   : > { %v1131_v2 = vpop.permute.xlu0 %1130  ;;  %v1364_v37 = vrot.slane %v1321_v20, 4 }
 0x160   : > { %v1291_v50 = vsel %vm618_vm2, %v1290_v57, %v1131_v2  ;;  %v1292_v18 = vrot.slane %v1131_v2, 4 }
 0x161   : > { %v1297_v17 = vperm.slane %v1291_v50, %v3417_v48  ;;  %v1317_v50 = vsel %vm618_vm2, %v3629_v8, %v1316_v3  ;;  %v1190_v8 = vrot.slane %v3595_v6, 4 }
 0x162   : > { %v1293_v47 = vsel %vm618_vm2, %v1143_v11, %v1292_v18  ;;  %v1327_v11 = vsel %vm618_vm2, %v1326_v42, %v1277_v45  ;;  %v1166_v18 = vrot.slane %v1081_v62, 4  ;;  %v1165_v42 = vperm.slane %v1157_v29, %v3417_v48 }
 0x163   : > { %v1301_v55 = vperm.slane %v1293_v47, %v3417_v48  ;;  %v1339_v57 = vsel %vm618_vm2, %v1338_v1, %v1297_v17  ;;  %v1340_v2 = vrot.slane %v1297_v17, 4  ;;  %v1329_v17 = vsel %vm618_vm2, %v1289_v58, %v1328_v51  ;;  %v3709_v47 = vld [vmem:[%s4515_s7 + $0x8] sm:$0xff] }
 0x164   : > { %v1345_v53 = vperm.slane %v1339_v57, %v3440_v9  ;;  %v1325_v51 = vperm.slane %v1317_v50, %v3440_v9  ;;  %v3716_v57 = vperm.slane %v1327_v11, %v3440_v9  ;;  %v1216_v5 = vrot.slane %v1165_v42, 4 }
 0x165   : > { %v1341_v1 = vsel %vm618_vm2, %v1309_v30, %v1340_v2  ;;  %v1352_v0 = vrot.slane %v1301_v55, 4 }
 0x166   : > { %v1349_v34 = vperm.slane %v1341_v1, %v3440_v9  ;;  %v1365_v59 = vsel %vm618_vm2, %v1345_v53, %v1364_v37  ;;  %v3704_v44 = vpop.permute.xlu2 %1126  ;;  %v1069_v49 = vpop.permute.xlu1 %1068  ;;  %v1362_v45 = vrot.slane %v1345_v53, 4  ;;  %v1204_v37 = vrot.slane %v1161_v38, 4 }
 0x167   : > { %v1167_v30 = vsel %vm618_vm2, %v1166_v18, %v1069_v49  ;;  %v1168_v3 = vrot.slane %v1069_v49, 4  ;;  %v1093_v58 = vpop.permute.xlu0 %1092  ;;  %v3720_v1 = vperm.slane %v1329_v17, %v3440_v9  ;;  %v1605_v53 = vadd.f32 %v1365_v59, %v3709_v47 }
 0x168   : > { %v1173_v2 = vperm.slane %v1167_v30, %v3417_v48  ;;  %v1351_v18 = vsel %vm618_vm2, %v1350_v19, %v1301_v55  ;;  %v1353_v29 = vsel %vm618_vm2, %v3657_v24, %v1352_v0  ;;  %v1366_v49 = vrot.slane %v1349_v34, 4 }
 0x169   : > { %v1169_v14 = vsel %vm618_vm2, %v1081_v62, %v1168_v3  ;;  %v1192_v50 = vrot.slane %v1093_v58, 4  ;;  %v1191_v30 = vsel %vm618_vm2, %v1190_v8, %v1093_v58  ;;  %2960 = vmatpush.xpose.msk.msra.mxu3 %vm1634_vm3, %v1605_v53  ;;  %v1363_v17 = vsel %vm618_vm2, %v1362_v45, %v1321_v20 }
 0x16a   : > { %v1177_v11 = vperm.slane %v1169_v14, %v3417_v48  ;;  %v1202_v10 = vrot.slane %v1173_v2, 4  ;;  %v1368_v62 = vrot.slane %v1325_v51, 4  ;;  %v1372_v59 = vrot.slane %v3716_v57, 4 }
 0x16b   : > { %v1180_v19 = vrot.slane %v3668_v61, 4  ;;  %v1376_v55 = vrot.slane %v3720_v1, 4  ;;  %v1357_v24 = vperm.slane %v1351_v18, %v3440_v9  ;;  %v3736_v0 = vperm.slane %v1353_v29, %v3440_v9 }
 0x16c   : > { %v1205_v14 = vsel %vm618_vm2, %v1173_v2, %v1204_v37  ;;  %v1193_v8 = vsel %vm618_vm2, %v3595_v6, %v1192_v50  ;;  %v1197_v20 = vperm.slane %v1191_v30, %v3417_v48  ;;  %v1603_v45 = vadd.f32 %v1363_v17, %v3709_v47 }
 0x16d   : > { %v1369_v3 = vsel %vm618_vm2, %v1349_v34, %v1368_v62  ;;  %v1203_v43 = vsel %vm618_vm2, %v1202_v10, %v1161_v38  ;;  %v1214_v22 = vrot.slane %v1177_v11, 4  ;;  %v1367_v29 = vsel %vm618_vm2, %v1366_v49, %v1325_v51 }
 0x16e   : > { %v1121_v58 = vpop.permute.xlu2 %1120  ;;  %v1099_v53 = vpop.permute.xlu1 %1098  ;;  %v1609_v18 = vadd.f32 %v1369_v3, %v3709_v47  ;;  %v3750_v2 = vperm.slane %v1205_v14, %v3440_v9  ;;  %2956 = vmatpush.xpose.msk.msra.mxu2 %vm1634_vm3, %v1603_v45  ;;  %v1607_v6 = vadd.f32 %v1367_v29, %v3709_v47  ;;  %v1502_v50 = vrot.slane %v3704_v44, 4 }
 0x16f   : > { %v3747_v63 = vpop.permute.xlu0 %1150  ;;  %v1490_v37 = vrot.slane %v1121_v58, 4  ;;  %v1178_v34 = vrot.slane %v1099_v53, 4  ;;  %v1217_v10 = vsel %vm618_vm2, %v1177_v11, %v1216_v5  ;;  %v1201_v38 = vperm.slane %v1193_v8, %v3417_v48 }
 0x170   : > { %2968 = vmatpush.xpose.msk.msra.mxu1 %vm1634_vm3, %v1609_v18  ;;  %v1181_v51 = vsel %vm618_vm2, %v1099_v53, %v1180_v19  ;;  %v1370_v49 = vrot.slane %v1357_v24, 4  ;;  %v1209_v30 = vperm.slane %v1203_v43, %v3440_v9  ;;  %2964 = vmatpush.xpose.msk.msra.mxu0 %vm1634_vm3, %v1607_v6  ;;  %v1215_v14 = vsel %vm618_vm2, %v1214_v22, %v1165_v42 }
 0x171   : > { %v1179_v17 = vsel %vm618_vm2, %v1178_v34, %v3668_v61  ;;  %v1189_v62 = vperm.slane %v1181_v51, %v3417_v48  ;;  %v1226_v45 = vrot.slane %v1197_v20, 4  ;;  %v4523_v5 = vrot.slane %v3383_v31, 4 }
 0x172   : > { %v1185_v8 = vperm.slane %v1179_v17, %v3417_v48  ;;  %v3771_v43 = vperm.slane %v1217_v10, %v3440_v9  ;;  %v1256_v3 = vrot.slane %v3750_v2, 4  ;;  %v1491_v61 = vsel %vm618_vm2, %v1490_v37, %v3383_v31 }
 0x173   : > { %v1493_v11 = vsel %vm618_vm2, %v1121_v58, %v4523_v5  ;;  %v1238_v53 = vrot.slane %v1201_v38, 4  ;;  %v1240_v18 = vrot.slane %v1189_v62, 4  ;;  %v3778_v29 = vperm.slane %v1215_v14, %v3440_v9 }
 0x174   : > { %v1227_v22 = vsel %vm618_vm2, %v1226_v45, %v1185_v8  ;;  %v1228_v42 = vrot.slane %v1185_v8, 4  ;;  %v1252_v58 = vrot.slane %v1209_v30, 4  ;;  %v1501_v6 = vperm.slane %v1493_v11, %v3417_v48 }
 0x175   : > { %v1233_v34 = vperm.slane %v1227_v22, %v3440_v9  ;;  %v1497_v17 = vperm.slane %v1491_v61, %v3417_v48  ;;  %v1526_v31 = vrot.slane %v3747_v63, 4  ;;  %v1373_v45 = vsel %vm618_vm2, %v1357_v24, %v1372_v59  ;;  %v3799_v59 = vld [vmem:[%s4515_s7] sm:$0xff] }
 0x176   : > { %v3782_v10 = vpop.permute.xlu2 %1082  ;;  %v1115_v51 = vpop.permute.xlu1 %1114  ;;  %v1371_v5 = vsel %vm618_vm2, %v1370_v49, %v3716_v57  ;;  %v1239_v14 = vsel %vm618_vm2, %v1238_v53, %v1189_v62  ;;  %v1377_v22 = vsel %vm618_vm2, %v3736_v0, %v1376_v55  ;;  %v1229_v19 = vsel %vm618_vm2, %v1197_v20, %v1228_v42 }
 0x177   : > { %v1139_v37 = vpop.permute.xlu0 %1138  ;;  %v1503_v8 = vsel %vm618_vm2, %v1502_v50, %v1115_v51  ;;  %v1504_v11 = vrot.slane %v1115_v51, 4  ;;  %v1241_v61 = vsel %vm618_vm2, %v1201_v38, %v1240_v18  ;;  %v1253_v57 = vsel %vm618_vm2, %v1233_v34, %v1252_v58 }
 0x178   : > { %v1509_v27 = vperm.slane %v1503_v8, %v3417_v48  ;;  %v1528_v50 = vrot.slane %v1139_v37, 4  ;;  %v1604_v49 = vadd.f32 %v1253_v57, %v3799_v59  ;;  %v1250_v55 = vrot.slane %v1233_v34, 4 }
 0x179   : > { %v1505_v24 = vsel %vm618_vm2, %v3704_v44, %v1504_v11  ;;  %v1540_v62 = vrot.slane %v1497_v17, 4  ;;  %v1245_v20 = vperm.slane %v1239_v14, %v3440_v9  ;;  %v1613_v53 = vadd.f32 %v1373_v45, %v3709_v47 }
 0x17a   : > { %v1513_v38 = vperm.slane %v1505_v24, %v3417_v48  ;;  %v3809_v42 = vperm.slane %v1241_v61, %v3440_v9  ;;  %v1527_v18 = vsel %vm618_vm2, %v1526_v31, %v1139_v37  ;;  %2961 = vmatpush.xpose.msk.msra.mxu3 %vm1634_vm3, %v1604_v49  ;;  %v1251_v44 = vsel %vm618_vm2, %v1250_v55, %v1209_v30 }
 0x17b   : > { %v1237_v58 = vperm.slane %v1229_v19, %v3440_v9  ;;  %v1552_v51 = vrot.slane %v1501_v6, 4  ;;  %v1538_v34 = vrot.slane %v1509_v27, 4  ;;  %v1611_v14 = vadd.f32 %v1371_v5, %v3709_v47 }
 0x17c   : > { %v1617_v8 = vadd.f32 %v1377_v22, %v3709_v47  ;;  %v1541_v45 = vsel %vm618_vm2, %v1509_v27, %v1540_v62  ;;  %v1550_v11 = vrot.slane %v1513_v38, 4  ;;  %v1529_v31 = vsel %vm618_vm2, %v3747_v63, %v1528_v50 }
 0x17d   : > { %v1602_v37 = vadd.f32 %v1251_v44, %v3799_v59  ;;  %v3823_v19 = vperm.slane %v1527_v18, %v3417_v48  ;;  %v1257_v57 = vsel %vm618_vm2, %v1237_v58, %v1256_v3  ;;  %2962 = vmatmul.msk.f32.vlgmr.msra.gmra.mxu3 %vm1634_vm3, %v3483_v56  ;;  %v1260_v27 = vrot.slane %v3778_v29, 4 }
 0x17e   : > { %2976 = vmatpush.xpose.msk.msrb.mxu3 %vm1634_vm3, %v1613_v53  ;;  %v1071_v61 = vpop.permute.xlu2 %1070  ;;  %v1145_v30 = vpop.permute.xlu1 %1144  ;;  %v1258_v24 = vrot.slane %v1245_v20, 4  ;;  %v1262_v63 = vrot.slane %v3809_v42, 4  ;;  %v1390_v50 = vrot.slane %v3782_v10, 4  ;;  %v1608_v49 = vadd.f32 %v1257_v57, %v3799_v59 }
 0x17f   : > { %v1392_v5 = vrot.slane %v1071_v61, 4  ;;  %v3828_v22 = vpop.permute.xlu0 %1106  ;;  %2957 = vmatpush.xpose.msk.msra.mxu2 %vm1634_vm3, %v1602_v37  ;;  %v1539_v55 = vsel %vm618_vm2, %v1538_v34, %v1497_v17  ;;  %v3837_v3 = vperm.slane %v1541_v45, %v3440_v9  ;;  %v3840_v56 = vperm.slane %v1529_v31, %v3417_v48 }
 0x180   : > { %v1254_v62 = vrot.slane %v1237_v58, 4  ;;  %v1551_v53 = vsel %vm618_vm2, %v1550_v11, %v1501_v6  ;;  %v1553_v18 = vsel %vm618_vm2, %v1513_v38, %v1552_v51  ;;  %2969 = vmatpush.xpose.msk.msra.mxu1 %vm1634_vm3, %v1608_v49  ;;  %v1261_v17 = vsel %vm618_vm2, %v1245_v20, %v1260_v27 }
 0x181   : > { %v1393_v44 = vsel %vm618_vm2, %v3782_v10, %v1392_v5  ;;  %v1562_v34 = vrot.slane %v3823_v19, 4  ;;  %v1612_v6 = vadd.f32 %v1261_v17, %v3799_v59  ;;  %v4524_v38 = vrot.slane %v3736_v0, 4 }
 0x182   : > { %v1255_v45 = vsel %vm618_vm2, %v1254_v62, %v3750_v2  ;;  %2958 = vmatmul.msk.f32.vlgmr.msra.gmra.mxu2 %vm1634_vm3, %v3492_v4  ;;  %v1391_v10 = vsel %vm618_vm2, %v1390_v50, %v1071_v61  ;;  %v1514_v20 = vrot.slane %v1145_v30, 4  ;;  %v3865_v2 = vperm.slane %v1393_v44, %v3417_v48 }
 0x183   : > { %2972 = vmatpush.xpose.msk.msrb.mxu2 %vm1634_vm3, %v1611_v14  ;;  %v1375_v58 = vsel %vm618_vm2, %v4524_v38, %v3720_v1  ;;  %v1606_v51 = vadd.f32 %v1255_v45, %v3799_v59  ;;  %v1259_v14 = vsel %vm618_vm2, %v1258_v24, %v3778_v29  ;;  %2970 = vmatmul.msk.f32.vlgmr.msra.gmra.mxu1 %vm1634_vm3, %v3498_v7  ;;  %v1264_v0 = vrot.slane %v3771_v43, 4 }
 0x184   : > { %2984 = vmatpush.xpose.msk.msrb.mxu1 %vm1634_vm3, %v1617_v8  ;;  %2977 = vmatpush.xpose.msk.msrb.mxu3 %vm1634_vm3, %v1612_v6  ;;  %v1615_v4 = vadd.f32 %v1375_v58, %v3709_v47  ;;  %v1610_v1 = vadd.f32 %v1259_v14, %v3799_v59  ;;  %v3874_v8 = vperm.slane %v1539_v55, %v3440_v9  ;;  %v4525_v49 = vrot.slane %v3399_v35, 4 }
 0x185   : > { %v3877_v11 = vperm.slane %v1551_v53, %v3440_v9  ;;  %v3880_v29 = vperm.slane %v1553_v18, %v3440_v9  ;;  %2965 = vmatpush.xpose.msk.msra.mxu0 %vm1634_vm3, %v1606_v51  ;;  %v1263_v7 = vsel %vm618_vm2, %v1262_v63, %v3771_v43  ;;  %v1397_v61 = vperm.slane %v1391_v10, %v3417_v48 }
 0x186   : > { %v3885_v31 = vpop.permute.xlu2 %1100  ;;  %v1133_v37 = vpop.permute.xlu1 %1132  ;;  %v1265_v57 = vsel %vm618_vm2, %v3809_v42, %v1264_v0  ;;  %2963 = vmatmul.msk.f32.gmra.mxu3 %vm1634_vm3, %v3553_v15  ;;  %v1438_v62 = vrot.slane %v3865_v2, 4  ;;  %v1614_v42 = vadd.f32 %v1263_v7, %v3799_v59  ;;  %v966_v6 = vrot.slane %v3480_v54, 4 }
 0x187   : > { %2973 = vmatpush.xpose.msk.msrb.mxu2 %vm1634_vm3, %v1610_v1  ;;  %v1515_v5 = vsel %vm618_vm2, %v1514_v20, %v1133_v37  ;;  %v1516_v27 = vrot.slane %v1133_v37, 4  ;;  %v1077_v24 = vpop.permute.xlu0 %1076  ;;  %v1616_v50 = vadd.f32 %v1265_v57, %v3799_v59  ;;  %v1574_v38 = vrot.slane %v3840_v56, 4 }
 0x188   : > { %v1521_v43 = vperm.slane %v1515_v5, %v3417_v48  ;;  %v1378_v63 = vrot.slane %v1077_v24, 4  ;;  %v1381_v55 = vsel %vm618_vm2, %v1077_v24, %v4525_v49  ;;  %2966 = vmatmul.msk.f32.vlgmr.msra.gmra.mxu0 %vm1634_vm3, %v3507_v16  ;;  %v1592_v16 = vrot.slane %v3837_v3, 4 }
 0x189   : > { %2980 = vmatpush.xpose.msk.msrb.mxu0 %vm1634_vm3, %v1615_v4  ;;  %v1517_v53 = vsel %vm618_vm2, %v1145_v30, %v1516_v27  ;;  %v1389_v18 = vperm.slane %v1381_v55, %v3417_v48  ;;  %2985 = vmatpush.xpose.msk.msrb.mxu1 %vm1634_vm3, %v1616_v50  ;;  %v1588_v20 = vrot.slane %v3874_v8, 4  ;;  %v1600_v51 = vrot.slane %v3880_v29, 4 }
 0x18a   : > { %v1525_v15 = vperm.slane %v1517_v53, %v3417_v48  ;;  %v1563_v44 = vsel %vm618_vm2, %v1562_v34, %v1521_v43  ;;  %v1564_v17 = vrot.slane %v1521_v43, 4  ;;  %v1379_v45 = vsel %vm618_vm2, %v1378_v63, %v3399_v35  ;;  %2959 = vmatmul.msk.f32.gmra.mxu2 %vm1634_vm3, %v3560_v32 }
 0x18b   : > { %v1385_v30 = vperm.slane %v1379_v45, %v3417_v48  ;;  %v1569_v58 = vperm.slane %v1563_v44, %v3440_v9  ;;  %v1439_v35 = vsel %vm618_vm2, %v1438_v62, %v1389_v18  ;;  %v1440_v4 = vrot.slane %v1389_v18, 4  ;;  %2971 = vmatmul.msk.f32.gmra.mxu1 %vm1634_vm3, %v3563_v36 }
 0x18c   : > { %v1565_v34 = vsel %vm618_vm2, %v3823_v19, %v1564_v17  ;;  %v1576_v10 = vrot.slane %v1525_v15, 4  ;;  %v1575_v14 = vsel %vm618_vm2, %v1574_v38, %v1525_v15  ;;  %v1596_v32 = vrot.slane %v3877_v11, 4 }
 0x18d   : > { %2981 = vmatpush.xpose.msk.msrb.mxu0 %vm1634_vm3, %v1614_v42  ;;  %v1426_v1 = vrot.slane %v1397_v61, 4  ;;  %v1573_v19 = vperm.slane %v1565_v34, %v3440_v9  ;;  %v1428_v0 = vrot.slane %v1385_v30, 4  ;;  %v1414_v57 = vrot.slane %v3828_v22, 4 }
 0x18e   : > { %v3929_v7 = vpop.permute.xlu2 %583  ;;  %v1095_v37 = vpop.permute.xlu1 %1094  ;;  %v1402_v5 = vrot.slane %v3885_v31, 4  ;;  %v1577_v27 = vsel %vm618_vm2, %v3840_v56, %v1576_v10  ;;  %v3936_v24 = vperm.slane %v1439_v35, %v3440_v9  ;;  %v3939_v50 = vperm.slane %v1575_v14, %v3440_v9  ;;  %2978 = vmatmul.msk.f32.vlgmr.msrb.gmra.mxu3 %vm1634_vm3, %v3503_v13 }
 0x18f   : > { %v1089_v36 = vpop.permute.xlu0 %1088  ;;  %v1586_v43 = vrot.slane %v1569_v58, 4  ;;  %v1427_v63 = vsel %vm618_vm2, %v1426_v1, %v1385_v30  ;;  %v954_v49 = vrot.slane %v3929_v7, 4  ;;  %v1589_v55 = vsel %vm618_vm2, %v1569_v58, %v1588_v20 }
 0x190   : > { %v1429_v62 = vsel %vm618_vm2, %v1397_v61, %v1428_v0  ;;  %v1441_v56 = vsel %vm618_vm2, %v3865_v2, %v1440_v4  ;;  %2967 = vmatmul.msk.f32.gmra.mxu0 %vm1634_vm3, %v3574_v46  ;;  %v1415_v42 = vsel %vm618_vm2, %v1414_v57, %v1095_v37  ;;  %v3953_v53 = vperm.slane %v1577_v27, %v3440_v9 }
 0x191   : > { %v1590_v18 = vrot.slane %v1573_v19, 4  ;;  %v955_v13 = vsel %vm618_vm2, %v954_v49, %v3347_v25  ;;  %v1416_v15 = vrot.slane %v1095_v37, 4  ;;  %v3958_v44 = vperm.slane %v1427_v63, %v3440_v9 }
 0x192   : > { %v1421_v61 = vperm.slane %v1415_v42, %v3417_v48  ;;  %v1403_v2 = vsel %vm618_vm2, %v1402_v5, %v1089_v36  ;;  %v1404_v17 = vrot.slane %v1089_v36, 4  ;;  %2974 = vmatmul.msk.f32.vlgmr.msrb.gmra.mxu2 %vm1634_vm3, %v3514_v28  ;;  %v1437_v46 = vperm.slane %v1429_v62, %v3440_v9 }
 0x193   : > { %v1417_v45 = vsel %vm618_vm2, %v3828_v22, %v1416_v15  ;;  %v1409_v38 = vperm.slane %v1403_v2, %v3417_v48  ;;  %v1621_v30 = vadd.f32 %v1589_v55, %v3709_v47  ;;  %v3970_v34 = vperm.slane %v955_v13, %v3417_v48  ;;  %2986 = vmatmul.msk.f32.vlgmr.msrb.gmra.mxu1 %vm1634_vm3, %v3523_v39 }
 0x194   : > { %v1425_v58 = vperm.slane %v1417_v45, %v3417_v48  ;;  %v1450_v10 = vrot.slane %v1421_v61, 4  ;;  %v1405_v35 = vsel %vm618_vm2, %v3885_v31, %v1404_v17  ;;  %v1587_v22 = vsel %vm618_vm2, %v1586_v43, %v3874_v8 }
 0x195   : > { %v1413_v28 = vperm.slane %v1405_v35, %v3417_v48  ;;  %v1452_v20 = vrot.slane %v1409_v38, 4  ;;  %2992 = vmatpush.xpose.msk.msra.mxu3 %vm1634_vm3, %v1621_v30  ;;  %v1593_v14 = vsel %vm618_vm2, %v1573_v19, %v1592_v16  ;;  %v1619_v31 = vadd.f32 %v1587_v22, %v3709_v47 }
 0x196   : > { %v3982_v4 = vpop.permute.xlu1 %577  ;;  %v1462_v1 = vrot.slane %v1425_v58, 4  ;;  %v1451_v0 = vsel %vm618_vm2, %v1450_v10, %v1409_v38  ;;  %v1625_v37 = vadd.f32 %v1593_v14, %v3709_v47  ;;  %v1591_v8 = vsel %vm618_vm2, %v1590_v18, %v3837_v3  ;;  %2979 = vmatmul.msk.f32.gmra.mxu3 %vm1634_vm3, %v3550_v12 }
 0x197   : > { %v3987_v39 = vpop.permute.xlu0 %613  ;;  %v1453_v57 = vsel %vm618_vm2, %v1421_v61, %v1452_v20  ;;  %v1457_v5 = vperm.slane %v1451_v0, %v3440_v9  ;;  %v1464_v27 = vrot.slane %v1413_v28, 4  ;;  %v1594_v16 = vrot.slane %v3939_v50, 4  ;;  %2988 = vmatpush.xpose.msk.msra.mxu2 %vm1634_vm3, %v1619_v31 }
 0x198   : > { %v3997_v19 = vperm.slane %v1441_v56, %v3440_v9  ;;  %v1461_v36 = vperm.slane %v1453_v57, %v3440_v9  ;;  %2982 = vmatmul.msk.f32.vlgmr.msrb.gmra.mxu0 %vm1634_vm3, %v3529_v33  ;;  %v1623_v43 = vadd.f32 %v1591_v8, %v3709_v47  ;;  %v1598_v63 = vrot.slane %v3953_v53, 4  ;;  %3000 = vmatpush.xpose.msk.msra.mxu1 %vm1634_vm3, %v1625_v37 }
 0x199   : > { %v1484_v3 = vrot.slane %v3936_v24, 4  ;;  %v1463_v12 = vsel %vm618_vm2, %v1462_v1, %v1413_v28  ;;  %v967_v49 = vsel %vm618_vm2, %v966_v6, %v3982_v4  ;;  %v4526_v55 = vrot.slane %v3347_v25, 4 }
 0x19a   : > { %v1474_v62 = vrot.slane %v1457_v5, 4  ;;  %v1478_v56 = vrot.slane %v1461_v36, 4  ;;  %2996 = vmatpush.xpose.msk.msra.mxu0 %vm1634_vm3, %v1623_v43  ;;  %v973_v42 = vperm.slane %v967_v49, %v3417_v48  ;;  %2975 = vmatmul.msk.f32.gmra.mxu2 %vm1634_vm3, %v3566_v40  ;;  %v1004_v18 = vrot.slane %v3970_v34, 4 }
 0x19b   : > { %v4016_v33 = vsel %vm618_vm2, %v3929_v7, %v4526_v55  ;;  %v1465_v13 = vsel %vm618_vm2, %v1425_v58, %v1464_v27  ;;  %v1476_v6 = vrot.slane %v3958_v44, 4  ;;  %v1480_v25 = vrot.slane %v1437_v46, 4  ;;  %2987 = vmatmul.msk.f32.gmra.mxu1 %vm1634_vm3, %v3569_v41 }
 0x19c   : > { %v1469_v15 = vperm.slane %v1463_v12, %v3440_v9  ;;  %v968_v7 = vrot.slane %v3982_v4, 4  ;;  %v990_v61 = vrot.slane %v3987_v39, 4  ;;  %v1597_v40 = vsel %vm618_vm2, %v3939_v50, %v1596_v32 }
 0x19d   : > { %v1002_v2 = vrot.slane %v973_v42, 4  ;;  %v1477_v17 = vsel %vm618_vm2, %v1457_v5, %v1476_v6  ;;  %v1481_v45 = vsel %vm618_vm2, %v1461_v36, %v1480_v25  ;;  %v1601_v38 = vsel %vm618_vm2, %v3953_v53, %v1600_v51  ;;  %v596_v53 = vpop.permute.xlu2 %595 }
 0x19e   : > { %v4040_v30 = vpop.permute.xlu1 %607  ;;  %v1620_v58 = vadd.f32 %v1477_v17, %v3799_v59  ;;  %v1624_v41 = vadd.f32 %v1481_v45, %v3799_v59  ;;  %v1475_v10 = vsel %vm618_vm2, %v1474_v62, %v3958_v44  ;;  %v1479_v32 = vsel %vm618_vm2, %v1478_v56, %v1437_v46 }
 0x19f   : > { %v602_v50 = vpop.permute.xlu0 %601  ;;  %v1629_v35 = vadd.f32 %v1597_v40, %v3709_v47  ;;  %v1618_v28 = vadd.f32 %v1475_v10, %v3799_v59  ;;  %v1622_v20 = vadd.f32 %v1479_v32, %v3799_v59  ;;  %v1595_v51 = vsel %vm618_vm2, %v1594_v16, %v3877_v11  ;;  %v4527_v32 = vld [vmem:[#allocation5_spill] sm:$0xff] }
 0x1a0   : > { %v1005_v22 = vsel %vm618_vm2, %v973_v42, %v1004_v18  ;;  %2983 = vmatmul.msk.f32.gmra.mxu0 %vm1634_vm3, %v3580_v52  ;;  %2993 = vmatpush.xpose.msk.msra.mxu3 %vm1634_vm3, %v1620_v58  ;;  %v1633_v44 = vadd.f32 %v1601_v38, %v3709_v47  ;;  %v1599_v46 = vsel %vm618_vm2, %v1598_v63, %v3880_v29  ;;  %v978_v14 = vrot.slane %v4040_v30, 4 }
 0x1a1   : > { %3001 = vmatpush.xpose.msk.msra.mxu1 %vm1634_vm3, %v1624_v41  ;;  %v1627_v11 = vadd.f32 %v1595_v51, %v3709_v47  ;;  %v1631_v4 = vadd.f32 %v1599_v46, %v3709_v47  ;;  %v991_v1 = vsel %vm618_vm2, %v990_v61, %v602_v50  ;;  %v992_v52 = vrot.slane %v602_v50, 4  ;;  %2989 = vmatpush.xpose.msk.msra.mxu2 %vm1634_vm3, %v1618_v28  ;;  %v4529_v51 = vld [vmem:[#allocation7_spill] sm:$0xff] }
 0x1a2   : > { %v979_v0 = vsel %vm618_vm2, %v978_v14, %v596_v53  ;;  %v997_v29 = vperm.slane %v991_v1, %v3417_v48  ;;  %v1485_v31 = vsel %vm618_vm2, %v1469_v15, %v1484_v3  ;;  %v1482_v37 = vrot.slane %v1469_v15, 4  ;;  %2997 = vmatpush.xpose.msk.msra.mxu0 %vm1634_vm3, %v1622_v20  ;;  %v4528_v20 = vld [vmem:[#allocation6_spill] sm:$0xff] }
 0x1a3   : > { %v1488_v57 = vrot.slane %v3997_v19, 4  ;;  %v980_v5 = vrot.slane %v596_v53, 4  ;;  %v969_v47 = vsel %vm618_vm2, %v3480_v54, %v968_v7  ;;  %2994 = vmatmul.msk.f32.vlgmr.msra.gmra.mxu3 %vm1634_vm3, %v3618_v60  ;;  %v985_v27 = vperm.slane %v979_v0, %v3417_v48 }
 0x1a4   : > { %3008 = vmatpush.xpose.msk.msrb.mxu3 %vm1634_vm3, %v1629_v35  ;;  %v1026_v8 = vrot.slane %v997_v29, 4  ;;  %v1628_v16 = vadd.f32 %v1485_v31, %v3799_v59  ;;  %v1473_v36 = vperm.slane %v1465_v13, %v3440_v9  ;;  %v1483_v43 = vsel %vm618_vm2, %v1482_v37, %v3936_v24  ;;  %2990 = vmatmul.msk.f32.vlgmr.msra.gmra.mxu2 %vm1634_vm3, %v3636_v21 }
 0x1a5   : > { %3016 = vmatpush.xpose.msk.msrb.mxu1 %vm1634_vm3, %v1633_v44  ;;  %3004 = vmatpush.xpose.msk.msrb.mxu2 %vm1634_vm3, %v1627_v11  ;;  %v1028_v54 = vrot.slane %v985_v27, 4  ;;  %v993_v63 = vsel %vm618_vm2, %v3987_v39, %v992_v52  ;;  %v1003_v60 = vsel %vm618_vm2, %v1002_v2, %v3970_v34  ;;  %v1013_v3 = vperm.slane %v1005_v22, %v3440_v9  ;;  %v4530_v44 = vld [vmem:[#allocation8_spill] sm:$0xff] }
 0x1a6   : > { %3012 = vmatpush.xpose.msk.msrb.mxu0 %vm1634_vm3, %v1631_v4  ;;  %3002 = vmatmul.msk.f32.vlgmr.msra.gmra.mxu1 %vm1634_vm3, %v3642_v26  ;;  %v1489_v12 = vsel %vm618_vm2, %v1473_v36, %v1488_v57  ;;  %v1626_v24 = vadd.f32 %v1483_v43, %v3799_v59  ;;  %v1486_v49 = vrot.slane %v1473_v36, 4  ;;  %v1009_v39 = vperm.slane %v1003_v60, %v3440_v9 }
 0x1a7   : > { %v1632_v55 = vadd.f32 %v1489_v12, %v3799_v59  ;;  %v1027_v21 = vsel %vm618_vm2, %v1026_v8, %v985_v27  ;;  %v1029_v26 = vsel %vm618_vm2, %v997_v29, %v1028_v54  ;;  %v1056_v62 = vrot.slane %v1013_v3, 4 }
 0x1a8   : > { %3009 = vmatpush.xpose.msk.msrb.mxu3 %vm1634_vm3, %v1628_v16  ;;  %2998 = vmatmul.msk.f32.vlgmr.msra.gmra.mxu0 %vm1634_vm3, %v3651_v23  ;;  %v1487_v34 = vsel %vm618_vm2, %v1486_v49, %v3997_v19  ;;  %v1033_v56 = vperm.slane %v1027_v21, %v3440_v9  ;;  %v1052_v42 = vrot.slane %v1009_v39, 4  ;;  %v1037_v18 = vperm.slane %v1029_v26, %v3440_v9 }
 0x1a9   : > { %3005 = vmatpush.xpose.msk.msrb.mxu2 %vm1634_vm3, %v1626_v24  ;;  %v977_v13 = vperm.slane %v969_v47, %v3417_v48  ;;  %v981_v6 = vsel %vm618_vm2, %v4040_v30, %v980_v5  ;;  %v1001_v25 = vperm.slane %v993_v63, %v3417_v48  ;;  %3017 = vmatpush.xpose.msk.msrb.mxu1 %vm1634_vm3, %v1632_v55 }
 0x1aa   : > { %v1630_v23 = vadd.f32 %v1487_v34, %v3799_v59  ;;  %v1053_v15 = vsel %vm618_vm2, %v1033_v56, %v1052_v42  ;;  %v1050_v7 = vrot.slane %v1033_v56, 4  ;;  %v1057_v19 = vsel %vm618_vm2, %v1037_v18, %v1056_v62 }
 0x1ab   : > { %v1054_v61 = vrot.slane %v1037_v18, 4  ;;  %2995 = vmatmul.msk.f32.gmra.mxu3 %vm1634_vm3, %v1053_v15  ;;  %v989_v40 = vperm.slane %v981_v6, %v3417_v48  ;;  %v965_v17 = vperm.slane %v4016_v33, %v3417_v48  ;;  %v1014_v45 = vrot.slane %v977_v13, 4 }
 0x1ac   : > { %3013 = vmatpush.xpose.msk.msrb.mxu0 %vm1634_vm3, %v1630_v23  ;;  %v1051_v2 = vsel %vm618_vm2, %v1050_v7, %v1009_v39  ;;  %v1038_v38 = vrot.slane %v1001_v25, 4 }
 0x1ad   : > { %2991 = vmatmul.msk.f32.gmra.mxu2 %vm1634_vm3, %v1051_v2  ;;  %v1055_v59 = vsel %vm618_vm2, %v1054_v61, %v1013_v3  ;;  %v1040_v30 = vrot.slane %v989_v40, 4  ;;  %v1016_v58 = vrot.slane %v965_v17, 4  ;;  %v1015_v41 = vsel %vm618_vm2, %v1014_v45, %v965_v17 }
 0x1ae   : > { %3003 = vmatmul.msk.f32.gmra.mxu1 %vm1634_vm3, %v1057_v19  ;;  %v1039_v10 = vsel %vm618_vm2, %v1038_v38, %v989_v40  ;;  %v1021_v50 = vperm.slane %v1015_v41, %v3440_v9 }
 0x1af   : > { %v1017_v33 = vsel %vm618_vm2, %v977_v13, %v1016_v58  ;;  %v1045_v35 = vperm.slane %v1039_v10, %v3440_v9  ;;  %v1041_v28 = vsel %vm618_vm2, %v1001_v25, %v1040_v30 }
 0x1b0   : > { %2999 = vmatmul.msk.f32.gmra.mxu0 %vm1634_vm3, %v1055_v59  ;;  %v1025_v53 = vperm.slane %v1017_v33, %v3440_v9  ;;  %v1049_v22 = vperm.slane %v1041_v28, %v3440_v9  ;;  %v1060_v46 = vrot.slane %v1021_v50, 4 }
 0x1b1   : > { %v1058_v14 = vrot.slane %v1045_v35, 4 }
 0x1b2   : > { %v1061_v11 = vsel %vm618_vm2, %v1045_v35, %v1060_v46  ;;  %v1064_v4 = vrot.slane %v1025_v53, 4  ;;  %v1062_v1 = vrot.slane %v1049_v22, 4 }
 0x1b3   : > { %3010 = vmatmul.msk.f32.vlgmr.msrb.gmra.mxu3 %vm1634_vm3, %v4527_v32  ;;  %v1059_v52 = vsel %vm618_vm2, %v1058_v14, %v1021_v50 }
 0x1b4   : > { %v1065_v0 = vsel %vm618_vm2, %v1049_v22, %v1064_v4  ;;  %v1063_v29 = vsel %vm618_vm2, %v1062_v1, %v1025_v53 }
 0x1b5   : > { %3006 = vmatmul.msk.f32.vlgmr.msrb.gmra.mxu2 %vm1634_vm3, %v4528_v20 }
 0x1b6   : > { %3018 = vmatmul.msk.f32.vlgmr.msrb.gmra.mxu1 %vm1634_vm3, %v4529_v51 }
 0x1b8   : > { %3014 = vmatmul.msk.f32.vlgmr.msrb.gmra.mxu0 %vm1634_vm3, %v4530_v44 }
 0x1bb   : > { %3011 = vmatmul.msk.f32.gmra.mxu3 %vm1634_vm3, %v1061_v11 }
 0x1bd   : > { %3007 = vmatmul.msk.f32.gmra.mxu2 %vm1634_vm3, %v1059_v52 }
 0x1be   : > { %3019 = vmatmul.msk.f32.gmra.mxu1 %vm1634_vm3, %v1065_v0 }
 0x1c0   : > { %3015 = vmatmul.msk.f32.gmra.mxu0 %vm1634_vm3, %v1063_v29 }
 0x1ca   : > { %v4148_v31 = vpop.f32.mrf.mxu1  ;;  %v4150_v37 = vpop.f32.mrf.mxu0 }
 0x1d3   : > { %v4152_v57 = vpop.f32.mrf.mxu1  ;;  %v4154_v5 = vpop.f32.mrf.mxu0 }
 0x200   : > { %v1769_v47 = vpop.f32.mrf.mxu1  ;;  %v1699_v27 = vpop.f32.mrf.mxu3 }
 0x201   : > { %v2207_v36 = vrot.slane %v1769_v47, 4  ;;  %v2209_v60 = vrot.slane %v1699_v27, 4 }
 0x203   : > { %v2208_v63 = vsel %vm618_vm2, %v2207_v36, %v1699_v27  ;;  %v2210_v21 = vsel %vm618_vm2, %v1769_v47, %v2209_v60 }
 0x204   : > { %v2214_v49 = vperm.slane %v2208_v63, %v3417_v48  ;;  %v2218_v34 = vperm.slane %v2210_v21, %v3417_v48 }
 0x205   : > { %v1734_v8 = vpop.f32.mrf.mxu0  ;;  %v1664_v16 = vpop.f32.mrf.mxu2 }
 0x206   : > { %v2195_v54 = vrot.slane %v1734_v8, 4  ;;  %v2197_v12 = vrot.slane %v1664_v16, 4  ;;  %v2243_v56 = vrot.slane %v2214_v49, 4  ;;  %v2255_v19 = vrot.slane %v2218_v34, 4 }
 0x208   : > { %v4156_v43 = vpop.f32.mrf.mxu1  ;;  %v2196_v24 = vsel %vm618_vm2, %v2195_v54, %v1664_v16  ;;  %v2198_v26 = vsel %vm618_vm2, %v1734_v8, %v2197_v12 }
 0x209   : > { %v4159_v3 = vpop.f32.mrf.mxu3  ;;  %v2202_v62 = vperm.slane %v2196_v24, %v3417_v48  ;;  %v2206_v18 = vperm.slane %v2198_v26, %v3417_v48  ;;  %v2431_v23 = vrot.slane %v4156_v43, 4 }
 0x20a   : > { %v2433_v58 = vrot.slane %v4159_v3, 4 }
 0x20b   : > { %v2245_v25 = vrot.slane %v2202_v62, 4  ;;  %v2244_v61 = vsel %vm618_vm2, %v2243_v56, %v2202_v62  ;;  %v2257_v45 = vrot.slane %v2206_v18, 4  ;;  %v2432_v38 = vsel %vm618_vm2, %v2431_v23, %v4159_v3 }
 0x20c   : > { %v2250_v35 = vperm.slane %v2244_v61, %v3440_v9  ;;  %v4185_v28 = vperm.slane %v2432_v38, %v3417_v48  ;;  %v2256_v22 = vsel %vm618_vm2, %v2255_v19, %v2206_v18  ;;  %v2434_v61 = vsel %vm618_vm2, %v4156_v43, %v2433_v58 }
 0x20d   : > { %v4163_v39 = vpop.f32.mrf.mxu0  ;;  %v4165_v55 = vpop.f32.mrf.mxu2  ;;  %v2246_v10 = vsel %vm618_vm2, %v2214_v49, %v2245_v25  ;;  %v2258_v4 = vsel %vm618_vm2, %v2218_v34, %v2257_v45  ;;  %v2442_v58 = vperm.slane %v2434_v61, %v3417_v48 }
 0x20e   : > { %v2419_v44 = vrot.slane %v4163_v39, 4  ;;  %v2254_v11 = vperm.slane %v2246_v10, %v3440_v9  ;;  %v2293_v16 = vrot.slane %v2250_v35, 4  ;;  %v2266_v12 = vperm.slane %v2258_v4, %v3440_v9 }
 0x20f   : > { %v2467_v38 = vrot.slane %v4185_v28, 4 }
 0x210   : > { %v1909_v42 = vpop.f32.mrf.mxu1  ;;  %v2420_v36 = vsel %vm618_vm2, %v2419_v44, %v4165_v55  ;;  %v2305_v43 = vrot.slane %v2266_v12, 4 }
 0x211   : > { %v2231_v13 = vrot.slane %v1909_v42, 4  ;;  %v1839_v6 = vpop.f32.mrf.mxu3 }
 0x212   : > { %v2233_v7 = vrot.slane %v1839_v6, 4 }
 0x213   : > { %v2232_v15 = vsel %vm618_vm2, %v2231_v13, %v1839_v6 }
 0x214   : > { %v2238_v2 = vperm.slane %v2232_v15, %v3417_v48  ;;  %v2234_v32 = vsel %vm618_vm2, %v1909_v42, %v2233_v7  ;;  %v2297_v42 = vrot.slane %v2254_v11, 4 }
 0x215   : > { %v1874_v40 = vpop.f32.mrf.mxu0  ;;  %v1804_v17 = vpop.f32.mrf.mxu2  ;;  %v2242_v1 = vperm.slane %v2234_v32, %v3417_v48 }
 0x216   : > { %v2219_v59 = vrot.slane %v1874_v40, 4  ;;  %v2221_v30 = vrot.slane %v1804_v17, 4  ;;  %v2267_v41 = vrot.slane %v2238_v2, 4 }
 0x217   : > { %v2279_v62 = vrot.slane %v2242_v1, 4 }
 0x218   : > { %v2220_v33 = vsel %vm618_vm2, %v2219_v59, %v1804_v17  ;;  %v2222_v50 = vsel %vm618_vm2, %v1874_v40, %v2221_v30  ;;  %v1912_v53 = vpop.f32.mrf.mxu1  ;;  %v2421_v40 = vrot.slane %v4165_v55, 4  ;;  %v2262_v55 = vperm.slane %v2256_v22, %v3440_v9 }
 0x219   : > { %v2226_v20 = vperm.slane %v2220_v33, %v3417_v48  ;;  %v2230_v51 = vperm.slane %v2222_v50, %v3417_v48  ;;  %v2455_v46 = vrot.slane %v1912_v53, 4  ;;  %v1842_v14 = vpop.f32.mrf.mxu3 }
 0x21a   : > { %v2457_v27 = vrot.slane %v1842_v14, 4  ;;  %v2301_v4 = vrot.slane %v2262_v55, 4 }
 0x21b   : > { %v2269_v52 = vrot.slane %v2226_v20, 4  ;;  %v2281_v0 = vrot.slane %v2230_v51, 4  ;;  %v2268_v29 = vsel %vm618_vm2, %v2267_v41, %v2226_v20  ;;  %v2456_v47 = vsel %vm618_vm2, %v2455_v46, %v1842_v14 }
 0x21c   : > { %v2274_v8 = vperm.slane %v2268_v29, %v3440_v9  ;;  %v4200_v63 = vperm.slane %v2456_v47, %v3417_v48  ;;  %v2458_v18 = vsel %vm618_vm2, %v1912_v53, %v2457_v27  ;;  %v2280_v41 = vsel %vm618_vm2, %v2279_v62, %v2230_v51 }
 0x21d   : > { %v1877_v54 = vpop.f32.mrf.mxu0  ;;  %v1807_v60 = vpop.f32.mrf.mxu2  ;;  %v2270_v3 = vsel %vm618_vm2, %v2238_v2, %v2269_v52  ;;  %v2282_v26 = vsel %vm618_vm2, %v2242_v1, %v2281_v0  ;;  %v2426_v2 = vperm.slane %v2420_v36, %v3417_v48  ;;  %v2466_v59 = vperm.slane %v2458_v18, %v3417_v48 }
 0x21e   : > { %v2443_v24 = vrot.slane %v1877_v54, 4  ;;  %v2294_v49 = vsel %vm618_vm2, %v2274_v8, %v2293_v16  ;;  %v2291_v21 = vrot.slane %v2274_v8, 4  ;;  %v2445_v34 = vrot.slane %v1807_v60, 4 }
 0x21f   : > { %2645 = vrot.lane.b32.xlu0 %v2294_v49, %s3160_s26  ;;  %v2278_v56 = vperm.slane %v2270_v3, %v3440_v9  ;;  %v2491_v13 = vrot.slane %v4200_v63, 4  ;;  %v2290_v19 = vperm.slane %v2282_v26, %v3440_v9  ;;  %v2469_v20 = vrot.slane %v2426_v2, 4 }
 0x220   : > { %v2444_v6 = vsel %vm618_vm2, %v2443_v24, %v1807_v60  ;;  %v4212_v25 = vsel %vm618_vm2, %v2291_v21, %v2250_v35  ;;  %v2446_v17 = vsel %vm618_vm2, %v1877_v54, %v2445_v34  ;;  %v2422_v35 = vsel %vm618_vm2, %v4163_v39, %v2421_v40 }
 0x221   : > { %v2450_v23 = vperm.slane %v2444_v6, %v3417_v48  ;;  %v2298_v15 = vsel %vm618_vm2, %v2278_v56, %v2297_v42  ;;  %v2295_v7 = vrot.slane %v2278_v56, 4  ;;  %v2454_v10 = vperm.slane %v2446_v17, %v3417_v48 }
 0x222   : > { %2661 = vrot.lane.b32.xlu2 %v2298_v15, %s3163_s13  ;;  %v2303_v33 = vrot.slane %v2290_v19, 4  ;;  %v2306_v51 = vsel %vm618_vm2, %v2290_v19, %v2305_v43  ;;  %v2286_v44 = vperm.slane %v2280_v41, %v3440_v9  ;;  %v2468_v22 = vsel %vm618_vm2, %v2467_v38, %v2426_v2 }
 0x223   : > { %v2049_v45 = vpop.f32.mrf.mxu1  ;;  %v2296_v30 = vsel %vm618_vm2, %v2295_v7, %v2254_v11  ;;  %v2492_v50 = vsel %vm618_vm2, %v2491_v13, %v2450_v23  ;;  %v2503_v46 = vrot.slane %v2466_v59, 4  ;;  %v2493_v14 = vrot.slane %v2450_v23, 4 }
 0x224   : > { %2653 = vrot.lane.b32.xlu1 %v2296_v30, %s3162_s12  ;;  %v2498_v1 = vperm.slane %v2492_v50, %v3440_v9  ;;  %v2479_v52 = vrot.slane %v2442_v58, 4  ;;  %v2430_v0 = vperm.slane %v2422_v35, %v3417_v48  ;;  %v2505_v39 = vrot.slane %v2454_v10, 4 }
 0x225   : > { %v4231_v32 = vpop.f32.mrf.mxu0  ;;  %v2304_v29 = vsel %vm618_vm2, %v2303_v33, %v2266_v12  ;;  %v2302_v47 = vsel %vm618_vm2, %v2286_v44, %v2301_v4  ;;  %v2299_v8 = vrot.slane %v2286_v44, 4  ;;  %v2474_v16 = vperm.slane %v2468_v22, %v3440_v9 }
 0x226   : > { %v1979_v53 = vpop.f32.mrf.mxu3  ;;  %v2470_v36 = vsel %vm618_vm2, %v4185_v28, %v2469_v20  ;;  %v2319_v54 = vrot.slane %v2049_v45, 4  ;;  %v2494_v3 = vsel %vm618_vm2, %v4200_v63, %v2493_v14  ;;  %v2504_v24 = vsel %vm618_vm2, %v2503_v46, %v2454_v10 }
 0x227   : > { %2693 = vrot.lane.b32.xlu0 %v2306_v51, %s3159_s25  ;;  %v1944_v11 = vpop.f32.mrf.mxu2  ;;  %v2321_v60 = vrot.slane %v1979_v53, 4  ;;  %v2515_v12 = vrot.slane %v2498_v1, 4  ;;  %v2481_v49 = vrot.slane %v2430_v0, 4  ;;  %v2478_v62 = vperm.slane %v2470_v36, %v3440_v9 }
 0x228   : > { %v2320_v21 = vsel %vm618_vm2, %v2319_v54, %v1979_v53  ;;  %v2506_v34 = vsel %vm618_vm2, %v2466_v59, %v2505_v39  ;;  %v2300_v28 = vsel %vm618_vm2, %v2299_v8, %v2262_v55  ;;  %v2502_v63 = vperm.slane %v2494_v3, %v3440_v9 }
 0x229   : > { %v2480_v42 = vsel %vm618_vm2, %v2479_v52, %v2430_v0  ;;  %v2510_v18 = vperm.slane %v2504_v24, %v3440_v9  ;;  %v2307_v13 = vrot.slane %v4231_v32, 4  ;;  %v2322_v6 = vsel %vm618_vm2, %v2049_v45, %v2321_v60 }
 0x22a   : > { %2685 = vrot.lane.b32.xlu2 %v2304_v29, %s3164_s17  ;;  %v2517_v23 = vrot.slane %v2474_v16, 4  ;;  %v4269_v15 = vperm.slane %v2320_v21, %v3417_v48  ;;  %v2309_v7 = vrot.slane %v1944_v11, 4  ;;  %v4274_v61 = vperm.slane %v2506_v34, %v3440_v9 }
 0x22b   : > { %v4245_v27 = vpop.f32.mrf.mxu1  ;;  %v4277_v40 = vsel %vm618_vm2, %v2515_v12, %v2474_v16  ;;  %v2308_v2 = vsel %vm618_vm2, %v2307_v13, %v1944_v11  ;;  %v2521_v45 = vrot.slane %v2478_v62, 4  ;;  %v2486_v38 = vperm.slane %v2480_v42, %v3440_v9 }
 0x22c   : > { %2677 = vrot.lane.b32.xlu1 %v2302_v47, %s3161_s10  ;;  %v2518_v17 = vsel %vm618_vm2, %v2498_v1, %v2517_v23  ;;  %v4283_v59 = vperm.slane %v2322_v6, %v3417_v48  ;;  %v2519_v41 = vrot.slane %v2502_v63, 4  ;;  %v2523_v43 = vrot.slane %v2510_v18, 4 }
 0x22d   : > { %v4255_v26 = vpop.f32.mrf.mxu0  ;;  %v2482_v55 = vsel %vm618_vm2, %v2442_v58, %v2481_v49  ;;  %v2522_v10 = vsel %vm618_vm2, %v2502_v63, %v2521_v45  ;;  %v2355_v33 = vrot.slane %v4269_v15, 4  ;;  %v2310_v50 = vsel %vm618_vm2, %v4231_v32, %v2309_v7 }
 0x22e   : > { %v4260_v56 = vpop.f32.mrf.mxu3  ;;  %v2314_v35 = vperm.slane %v2308_v2, %v3417_v48  ;;  %v2527_v20 = vrot.slane %v4274_v61, 4  ;;  %v4295_v44 = vperm.slane %v2482_v55, %v3440_v9  ;;  %v2525_v22 = vrot.slane %v2486_v38, 4 }
 0x22f   : > { %2669 = vrot.lane.b32.xlu0 %v2300_v28, %s3165_s18  ;;  %v2367_v58 = vrot.slane %v4283_v59, 4  ;;  %v2543_v46 = vrot.slane %v4245_v27, 4  ;;  %v2520_v14 = vsel %vm618_vm2, %v2519_v41, %v2478_v62  ;;  %v2524_v32 = vsel %vm618_vm2, %v2523_v43, %v2486_v38 }
 0x230   : > { %v4271_v19 = vpop.f32.mrf.mxu2  ;;  %v4302_v4 = vperm.slane %v2310_v50, %v3417_v48  ;;  %v2356_v39 = vsel %vm618_vm2, %v2355_v33, %v2314_v35  ;;  %v2357_v29 = vrot.slane %v2314_v35, 4  ;;  %v2528_v16 = vsel %vm618_vm2, %v2527_v20, %v4295_v44 }
 0x231   : > { %v2526_v3 = vsel %vm618_vm2, %v2510_v18, %v2525_v22  ;;  %v2544_v24 = vsel %vm618_vm2, %v2543_v46, %v4260_v56  ;;  %v2531_v28 = vrot.slane %v4255_v26, 4  ;;  %v2362_v42 = vperm.slane %v2356_v39, %v3440_v9 }
 0x232   : > { %2701 = vrot.lane.b32.xlu2 %v2518_v17, %s3160_s26  ;;  %v2369_v34 = vrot.slane %v4302_v4, 4  ;;  %v4326_v7 = vperm.slane %v2544_v24, %v3417_v48  ;;  %v2358_v38 = vsel %vm618_vm2, %v4269_v15, %v2357_v29  ;;  %v2533_v24 = vrot.slane %v4271_v19, 4 }
 0x233   : > { %v2189_v30 = vpop.f32.mrf.mxu1  ;;  %v2532_v41 = vsel %vm618_vm2, %v2531_v28, %v4271_v19  ;;  %v2405_v20 = vrot.slane %v2362_v42, 4 }
 0x234   : > { %2717 = vrot.lane.b32.xlu1 %v2522_v10, %s3163_s13  ;;  %v2343_v53 = vrot.slane %v2189_v30, 4  ;;  %v2368_v10 = vsel %vm618_vm2, %v2367_v58, %v4302_v4  ;;  %v2579_v46 = vrot.slane %v4326_v7, 4  ;;  %v2538_v58 = vperm.slane %v2532_v41, %v3417_v48 }
 0x235   : > { %v2154_v51 = vpop.f32.mrf.mxu0  ;;  %v2374_v29 = vperm.slane %v2368_v10, %v3440_v9 }
 0x236   : > { %v2119_v11 = vpop.f32.mrf.mxu3  ;;  %v2331_v1 = vrot.slane %v2154_v51, 4 }
 0x237   : > { %2709 = vrot.lane.b32.xlu0 %v2520_v14, %s3162_s12  ;;  %v2344_v52 = vsel %vm618_vm2, %v2343_v53, %v2119_v11  ;;  %v2345_v0 = vrot.slane %v2119_v11, 4  ;;  %v2413_v41 = vrot.slane %v2374_v29, 4 }
 0x238   : > { %v2350_v47 = vperm.slane %v2344_v52, %v3417_v48  ;;  %v2084_v8 = vpop.f32.mrf.mxu2 }
 0x239   : > { %v2346_v36 = vsel %vm618_vm2, %v2189_v30, %v2345_v0  ;;  %v2332_v54 = vsel %vm618_vm2, %v2331_v1, %v2084_v8  ;;  %v2333_v60 = vrot.slane %v2084_v8, 4  ;;  %v2545_v30 = vrot.slane %v4260_v56, 4 }
 0x23a   : > { %v2354_v12 = vperm.slane %v2346_v36, %v3417_v48  ;;  %v2379_v49 = vrot.slane %v2350_v47, 4  ;;  %2725 = vrot.lane.b32.xlu2 %v2524_v32, %s3165_s18  ;;  %v2338_v21 = vperm.slane %v2332_v54, %v3417_v48  ;;  %v2366_v56 = vperm.slane %v2358_v38, %v3440_v9 }
 0x23b   : > { %v2192_v62 = vpop.f32.mrf.mxu1  ;;  %v2334_v63 = vsel %vm618_vm2, %v2154_v51, %v2333_v60 }
 0x23c   : > { %v2391_v18 = vrot.slane %v2354_v12, 4  ;;  %v2342_v13 = vperm.slane %v2334_v63, %v3417_v48  ;;  %v2381_v6 = vrot.slane %v2338_v21, 4  ;;  %2741 = vrot.lane.b32.xlu1 %v2528_v16, %s3164_s17  ;;  %v2380_v23 = vsel %vm618_vm2, %v2379_v49, %v2338_v21 }
 0x23d   : > { %v2567_v2 = vrot.slane %v2192_v62, 4  ;;  %v2157_v17 = vpop.f32.mrf.mxu0  ;;  %v2386_v45 = vperm.slane %v2380_v23, %v3440_v9  ;;  %v2409_v60 = vrot.slane %v2366_v56, 4  ;;  %v2580_v49 = vsel %vm618_vm2, %v2579_v46, %v2538_v58 }
 0x23e   : > { %v2122_v43 = vpop.f32.mrf.mxu3  ;;  %v2382_v55 = vsel %vm618_vm2, %v2350_v47, %v2381_v6  ;;  %v2393_v33 = vrot.slane %v2342_v13, 4  ;;  %v2555_v50 = vrot.slane %v2157_v17, 4  ;;  %v2392_v22 = vsel %vm618_vm2, %v2391_v18, %v2342_v13 }
 0x23f   : > { %2733 = vrot.lane.b32.xlu0 %v2526_v3, %s3161_s10  ;;  %v2568_v35 = vsel %vm618_vm2, %v2567_v2, %v2122_v43  ;;  %v2390_v51 = vperm.slane %v2382_v55, %v3440_v9  ;;  %v2406_v11 = vsel %vm618_vm2, %v2386_v45, %v2405_v20  ;;  %v2403_v39 = vrot.slane %v2386_v45, 4 }
 0x240   : > { %v2574_v15 = vperm.slane %v2568_v35, %v3417_v48  ;;  %v2087_v53 = vpop.f32.mrf.mxu2  ;;  %v2398_v47 = vperm.slane %v2392_v22, %v3440_v9  ;;  %v2394_v8 = vsel %vm618_vm2, %v2354_v12, %v2393_v33  ;;  %v2569_v16 = vrot.slane %v2122_v43, 4 }
 0x241   : > { %v2556_v14 = vsel %vm618_vm2, %v2555_v50, %v2087_v53  ;;  %v2557_v1 = vrot.slane %v2087_v53, 4  ;;  %v2407_v0 = vrot.slane %v2390_v51, 4  ;;  %v2546_v3 = vsel %vm618_vm2, %v4245_v27, %v2545_v30 }
 0x242   : > { %v2603_v32 = vrot.slane %v2574_v15, 4  ;;  %v2562_v52 = vperm.slane %v2556_v14, %v3417_v48  ;;  %v2410_v28 = vsel %vm618_vm2, %v2390_v51, %v2409_v60  ;;  %v2402_v63 = vperm.slane %v2394_v8, %v3440_v9 }
 0x243   : > { %v2408_v54 = vsel %vm618_vm2, %v2407_v0, %v2366_v56  ;;  %v2558_v12 = vsel %vm618_vm2, %v2157_v17, %v2557_v1  ;;  %v2581_v13 = vrot.slane %v2538_v58, 4  ;;  %v2411_v27 = vrot.slane %v2398_v47, 4 }
 0x244   : > { %v2605_v36 = vrot.slane %v2562_v52, 4  ;;  %2647 = vrot.lane.b32.xlu1 %v2406_v11, %s3160_s26  ;;  %2655 = vrot.lane.b32.xlu2 %v2408_v54, %s3162_s12  ;;  %v2604_v21 = vsel %vm618_vm2, %v2603_v32, %v2562_v52  ;;  %v4365_v19 = vsel %vm618_vm2, %v2403_v39, %v2362_v42  ;;  %v2570_v6 = vsel %vm618_vm2, %v2192_v62, %v2569_v16 }
 0x245   : > { %v2610_v18 = vperm.slane %v2604_v21, %v3440_v9  ;;  %v2586_v2 = vperm.slane %v2580_v49, %v3440_v9  ;;  %v2554_v45 = vperm.slane %v2546_v3, %v3417_v48  ;;  %v2566_v38 = vperm.slane %v2558_v12, %v3417_v48 }
 0x246   : > { %v2606_v23 = vsel %vm618_vm2, %v2574_v15, %v2605_v36  ;;  %v2370_v30 = vsel %vm618_vm2, %v4283_v59, %v2369_v34  ;;  %v2534_v42 = vsel %vm618_vm2, %v4255_v26, %v2533_v24  ;;  %v2415_v43 = vrot.slane %v2402_v63, 4 }
 0x247   : > { %2663 = vrot.lane.b32.xlu0 %v2410_v28, %s3163_s13  ;;  %v2627_v17 = vrot.slane %v2610_v18, 4  ;;  %v2578_v55 = vperm.slane %v2570_v6, %v3417_v48  ;;  %v2412_v10 = vsel %vm618_vm2, %v2411_v27, %v2374_v29  ;;  %v2582_v33 = vsel %vm618_vm2, %v4326_v7, %v2581_v13 }
 0x248   : > { %v2614_v4 = vperm.slane %v2606_v23, %v3440_v9  ;;  %v2414_v59 = vsel %vm618_vm2, %v2398_v47, %v2413_v41  ;;  %v2378_v26 = vperm.slane %v2370_v30, %v3440_v9  ;;  %v2617_v34 = vrot.slane %v2566_v38, 4 }
 0x249   : > { %v4379_v62 = vsel %vm618_vm2, %v2627_v17, %v2586_v2  ;;  %v2591_v50 = vrot.slane %v2554_v45, 4  ;;  %v2542_v35 = vperm.slane %v2534_v42, %v3417_v48  ;;  %v2590_v15 = vperm.slane %v2582_v33, %v3440_v9 }
 0x24a   : > { %v2416_v20 = vsel %vm618_vm2, %v2415_v43, %v2378_v26  ;;  %v2615_v53 = vrot.slane %v2578_v55, 4  ;;  %v2631_v7 = vrot.slane %v2614_v4, 4  ;;  %v2618_v56 = vsel %vm618_vm2, %v2578_v55, %v2617_v34 }
 0x24b   : > { %v2633_v51 = vrot.slane %v2590_v15, 4  ;;  %v2592_v22 = vsel %vm618_vm2, %v2591_v50, %v2542_v35  ;;  %v2593_v46 = vrot.slane %v2542_v35, 4  ;;  %v2629_v11 = vrot.slane %v2586_v2, 4 }
 0x24c   : > { %2671 = vrot.lane.b32.xlu1 %v2412_v10, %s3165_s18  ;;  %2679 = vrot.lane.b32.xlu2 %v2414_v59, %s3161_s10  ;;  %v2632_v58 = vsel %vm618_vm2, %v2631_v7, %v2590_v15  ;;  %v2616_v14 = vsel %vm618_vm2, %v2615_v53, %v2566_v38  ;;  %v2626_v32 = vperm.slane %v2618_v56, %v3440_v9  ;;  %v2417_v3 = vrot.slane %v2378_v26, 4 }
 0x24d   : > { %v2634_v48 = vsel %vm618_vm2, %v2614_v4, %v2633_v51  ;;  %v2598_v1 = vperm.slane %v2592_v22, %v3440_v9  ;;  %v2630_v52 = vsel %vm618_vm2, %v2610_v18, %v2629_v11  ;;  %v2622_v0 = vperm.slane %v2616_v14, %v3440_v9 }
 0x24e   : > { %v2594_v39 = vsel %vm618_vm2, %v2554_v45, %v2593_v46  ;;  %v2639_v29 = vrot.slane %v2626_v32, 4  ;;  %v2529_v24 = vrot.slane %v4295_v44, 4  ;;  %v2418_v49 = vsel %vm618_vm2, %v2402_v63, %v2417_v3 }
 0x24f   : > { %2687 = vrot.lane.b32.xlu0 %v2416_v20, %s3164_s17  ;;  %v2637_v47 = vrot.slane %v2598_v1, 4  ;;  %v2602_v8 = vperm.slane %v2594_v39, %v3440_v9  ;;  %v2635_v16 = vrot.slane %v2622_v0, 4 }
 0x250   : > { %v2530_v9 = vsel %vm618_vm2, %v4274_v61, %v2529_v24  ;;  %v456_v24 = vld [vmem:[%s4514_s6] sm:$0xff] }
 0x251   : > { %v2638_v36 = vsel %vm618_vm2, %v2622_v0, %v2637_v47  ;;  %v2640_v54 = vsel %vm618_vm2, %v2639_v29, %v2602_v8  ;;  %v2636_v60 = vsel %vm618_vm2, %v2635_v16, %v2598_v1  ;;  %v2641_v21 = vrot.slane %v2602_v8, 4 }
 0x253   : > { %v2642_v12 = vsel %vm618_vm2, %v2626_v32, %v2641_v21 }
 0x254   : > { %2711 = vrot.lane.b32.xlu1 %v2632_v58, %s3162_s12  ;;  %2719 = vrot.lane.b32.xlu2 %v2634_v48, %s3163_s13 }
 0x257   : > { %2703 = vrot.lane.b32.xlu0 %v2630_v52, %s3160_s26 }
 0x25c   : > { %2735 = vrot.lane.b32.xlu1 %v2638_v36, %s3161_s10  ;;  %2743 = vrot.lane.b32.xlu2 %v2640_v54, %s3164_s17  ;;  %s296_s17 = sand.u32 1, %s3148_s28   ;;  %s3108_s10 = sshra.s32 %s2869_s9, 4  ;;  %s3109_s10 = int_to_ptr.hbm [resolvable:$true] %s3108_s10 }
 0x25d   : > { %s3110_s12 = scalar_lea.hbm %s3109_s10, 32  ;;  %p3115_p0 = scmp.lt.s32.totalorder %s3109_s10, %s4516_s8 }
 0x25e   : > { %p3111_p11 = scmp.ne.s32.totalorder %s3109_s10, %s3110_s12  ;;  %p3116_p1 = scmp.lt.s32.totalorder %s3114_s22, %s3110_s12 }
 0x25f   : > { %2727 = vrot.lane.b32.xlu0 %v2636_v60, %s3165_s18  ;;  %s2935_s18 = sshll.u32 %s296_s17, 5 }
 0x260   : > { %s4465_s21 = scalar_lea.vmem [#allocation2], %s2935_s18  ;;  %p3112_p12 = pnand %p3111_p11, %p3252_p5 }
 0x261   : > { %s2866_s20 = sshll.u32 %s4465_s21, 4  ;;  %p3117_p2 = por %p3116_p1, %p3115_p0  ;;  %s2867_s20 = int_to_ptr.vmem [resolvable:$true] %s2866_s20 }
 0x262   : > { %p3113_p13 = pneg %p3112_p12 }
 0x264   : > { %2695 = vrot.lane.b32.xlu1 %v2418_v49, %s3159_s25  ;;  %2749 = vrot.lane.b32.xlu2 %v2530_v9, %s3159_s25  ;;  %p3118_p3 = pnand %p3117_p2, %p3113_p13 }
 0x267   : > { %2751 = vrot.lane.b32.xlu0 %v2642_v12, %s3159_s25  ;;  %s2854_s25 = scalar_lea.sflag [#allocation3], %s296_s17 }
 0x27c   : > { %v2662_v28 = vpop.permute.xlu2 %2661 }
 0x284   : > { %v2686_v18 = vpop.permute.xlu2 %2685 }
 0x28c   : > { %v2702_v13 = vpop.permute.xlu2 %2701 }
 0x28d   : > { %v2775_v10 = vsel %vm1634_vm3, %v4277_v40, %v2702_v13 }
 0x291   : > { %v2646_v27 = vpop.permute.xlu0 %2645 }
 0x292   : > { %v2755_v43 = vsel %vm1634_vm3, %v4212_v25, %v2646_v27 }
 0x294   : > { %v2726_v44 = vpop.permute.xlu2 %2725 }
 0x296   : > { %v2654_v6 = vpop.permute.xlu1 %2653 }
 0x297   : > { %v2758_v55 = vsel %vm2757_vm4, %v2755_v43, %v2654_v6 }
 0x298   : > { %v2761_v4 = vsel %vm2760_vm5, %v2758_v55, %v2662_v28 }
 0x299   : > { %v2694_v23 = vpop.permute.xlu0 %2693 }
 0x29e   : > { %v2678_v63 = vpop.permute.xlu1 %2677  ;;  %v2656_v2 = vpop.permute.xlu2 %2655 }
 0x2a1   : > { %v2670_v17 = vpop.permute.xlu0 %2669 }
 0x2a2   : > { %v2764_v26 = vsel %vm2763_vm6, %v2761_v4, %v2670_v17 }
 0x2a3   : > { %v2767_v25 = vsel %vm2766_vm7, %v2764_v26, %v2678_v63 }
 0x2a4   : > { %v2770_v15 = vsel %vm2769_vm8, %v2767_v25, %v2686_v18 }
 0x2a5   : > { %v2773_v22 = vsel %vm2772_vm9, %v2770_v15, %v2694_v23 }
 0x2a6   : > { %v2718_v45 = vpop.permute.xlu1 %2717  ;;  %v2680_v38 = vpop.permute.xlu2 %2679 }
 0x2a9   : > { %v2710_v61 = vpop.permute.xlu0 %2709 }
 0x2aa   : > { %v2777_v33 = vsel %vm2757_vm4, %v2775_v10, %v2710_v61 }
 0x2ab   : > { %v2779_v50 = vsel %vm2760_vm5, %v2777_v33, %v2718_v45 }
 0x2ac   : > { %v2781_v20 = vsel %vm2763_vm6, %v2779_v50, %v2726_v44 }
 0x2ae   : > { %v2742_v30 = vpop.permute.xlu1 %2741  ;;  %v2720_v42 = vpop.permute.xlu2 %2719 }
 0x2b1   : > { %v2734_v41 = vpop.permute.xlu0 %2733 }
 0x2b2   : > { %v2783_v40 = vsel %vm2766_vm7, %v2781_v20, %v2734_v41  ;;  %v457_v41 = vld [vmem:[%s4514_s6 + $0x8] sm:$0xff] }
 0x2b3   : > { %v2785_v7 = vsel %vm2769_vm8, %v2783_v40, %v2742_v30 }
 0x2b6   : > { %v2648_v59 = vpop.permute.xlu1 %2647  ;;  %v2744_v34 = vpop.permute.xlu2 %2743 }
 0x2b7   : > { %v2756_v52 = vsel %vm1634_vm3, %v4365_v19, %v2648_v59 }
 0x2b8   : > { %v2759_v29 = vsel %vm2757_vm4, %v2756_v52, %v2656_v2 }
 0x2b9   : > { %v2664_v35 = vpop.permute.xlu0 %2663 }
 0x2ba   : > { %v2762_v8 = vsel %vm2760_vm5, %v2759_v29, %v2664_v35 }
 0x2be   : > { %v2672_v53 = vpop.permute.xlu1 %2671  ;;  %v2750_v56 = vpop.permute.xlu2 %2749 }
 0x2bf   : > { %v2787_v51 = vsel %vm2772_vm9, %v2785_v7, %v2750_v56  ;;  %v2765_v16 = vsel %vm2763_vm6, %v2762_v8, %v2672_v53 }
 0x2c0   : > { %v2789_v58 = vmax.f32 %v2773_v22, %v2787_v51  ;;  %v2768_v54 = vsel %vm2766_vm7, %v2765_v16, %v2680_v38 }
 0x2c1   : > { %v2688_v46 = vpop.permute.xlu0 %2687 }
 0x2c2   : > { %2790 = vmax.xlane.f32.xlu1 %v2789_v58  ;;  %v2771_v60 = vsel %vm2769_vm8, %v2768_v54, %v2688_v46 }
 0x2c6   : > { %v2712_v14 = vpop.permute.xlu1 %2711 }
 0x2c9   : > { %v2704_v48 = vpop.permute.xlu0 %2703 }
 0x2ca   : > { %v2776_v11 = vsel %vm1634_vm3, %v4379_v62, %v2704_v48 }
 0x2cb   : > { %v2778_v1 = vsel %vm2757_vm4, %v2776_v11, %v2712_v14 }
 0x2cc   : > { %v2780_v39 = vsel %vm2760_vm5, %v2778_v1, %v2720_v42 }
 0x2ce   : > { %v2736_v32 = vpop.permute.xlu1 %2735 }
 0x2d1   : > { %v2728_v0 = vpop.permute.xlu0 %2727 }
 0x2d2   : > { %v2782_v47 = vsel %vm2763_vm6, %v2780_v39, %v2728_v0 }
 0x2d3   : > { %v2784_v36 = vsel %vm2766_vm7, %v2782_v47, %v2736_v32 }
 0x2d4   : > { %v2786_v19 = vsel %vm2769_vm8, %v2784_v36, %v2744_v34 }
 0x2d6   : > { %v2696_v62 = vpop.permute.xlu1 %2695 }
 0x2d7   : > { %v2774_v49 = vsel %vm2772_vm9, %v2771_v60, %v2696_v62 }
 0x2d9   : > { %v2752_v3 = vpop.permute.xlu0 %2751 }
 0x2da   : > { %v2788_v9 = vsel %vm2772_vm9, %v2786_v19, %v2752_v3 }
 0x2db   : > { %v2792_v21 = vmax.f32 %v2774_v49, %v2788_v9  ;;  %460 = vperm.xlu1 %3080, %v456_v24  }
 0x2dd   : > { %2793 = vmax.xlane.f32.xlu2 %v2792_v21 }
 0x335   : > { %v2791_v12 = vpop.xlane.xlu1 %2790 }
 0x336   : > { %v2795_v28 = vsub.f32 %v2773_v22, %v2791_v12  ;;  %v2796_v18 = vsub.f32 %v2787_v51, %v2791_v12 }
 0x338   : > { %v2799_v13 = vmul.f32 1.442695, %v2795_v28  ;;  %v2801_v27 = vmul.f32 1.442695, %v2796_v18 }
 0x33a   : > { %3082 = vpow2.f32 %v2799_v13 }
 0x33b   : > { %3084 = vpow2.f32 %v2801_v27 }
 0x340   : > { %v3083_v6 = vpop.eup %3082 }
 0x341   : > { %v3085_v44 = vpop.eup %3084 }
 0x342   : > { %v2807_v23 = vadd.f32 %v3085_v44, %v3083_v6 }
 0x344   : > { %2808 = vadd.xlane.f32.xlu0 %v2807_v23 }
 0x34d   : > { %v461_v50 = vpop.permute.xlu1 %460 }
 0x34e   : > { %v499_v40 = vadd.f32 %v4150_v37, %v461_v50  ;;  %v522_v15 = vadd.f32 %v4148_v31, %v461_v50 }
 0x350   : > { %v2794_v63 = vpop.xlane.xlu2 %2793 }
 0x351   : > { %v2797_v2 = vsub.f32 %v2774_v49, %v2794_v63  ;;  %v2798_v17 = vsub.f32 %v2788_v9, %v2794_v63 }
 0x353   : > { %v2803_v45 = vmul.f32 1.442695, %v2797_v2  ;;  %v2805_v38 = vmul.f32 1.442695, %v2798_v17 }
 0x355   : > { %3086 = vpow2.f32 %v2803_v45 }
 0x356   : > { %3088 = vpow2.f32 %v2805_v38 }
 0x35b   : > { %v3087_v61 = vpop.eup %3086 }
 0x35c   : > { %v3089_v30 = vpop.eup %3088 }
 0x35d   : > { %v2810_v42 = vadd.f32 %v3089_v30, %v3087_v61 }
 0x35f   : > { %2811 = vadd.xlane.f32.xlu2 %v2810_v42 }
 0x377   : > { %465 = vperm.xlu2 %3081, %v457_v41  }
 0x3b7   : > { %v2809_v43 = vpop.xlane.xlu0 %2808 }
 0x3b8   : > { %3090 = vrcp.f32 %v2809_v43  ;;  %v2824_v4 = vand.u32 2147483648, %v2809_v43  ;;  %v2822_v26 = vand.u32 2147483647, %v2809_v43  ;;  %vm2818_vm11 = vweird.f32 %v2809_v43 }
 0x3ba   : > { %v2825_v35 = vor.u32 1.1754944e-38, %v2824_v4  ;;  %vm2823_vm13 = vcmp.eq.f32.partialorder %v2822_v26, 8.507059e+37 }
 0x3be   : > { %v3091_v55 = vpop.eup %3090 }
 0x3bf   : > { %v2814_v10 = vmul.f32 %v3091_v55, %v2809_v43  ;;  %vm2819_vm10 = vweird.f32 %v3091_v55 }
 0x3c0   : > { %vm2820_vm12 = vmor %vm2818_vm11, %vm2819_vm10 }
 0x3c1   : > { %v2815_v33 = vsub.f32 1.0, %v2814_v10 }
 0x3c3   : > { %v2816_v59 = vmul.f32 %v3091_v55, %v2815_v33 }
 0x3c5   : > { %v2817_v34 = vadd.f32 %v3091_v55, %v2816_v59 }
 0x3c7   : > { %v2821_v25 = vsel %vm2820_vm12, %v3091_v55, %v2817_v34 }
 0x3c8   : > { %v2826_v20 = vsel %vm2823_vm13, %v2825_v35, %v2821_v25 }
 0x3c9   : > { %v2841_v53 = vmul.f32 %v3083_v6, %v2826_v20  ;;  %v2842_v7 = vmul.f32 %v3085_v44, %v2826_v20 }
 0x3cb   : > { %v2845_v56 = vmul.f32 %v2841_v53, %v499_v40  ;;  %v2846_v51 = vmul.f32 %v2842_v7, %v522_v15 }
 0x3cd   : > { %2849 = vst [vmem:[%s4465_s21] sm:$0xff] %v2845_v56 }
 0x3ce   : > { %2850 = vst [vmem:[%s4465_s21 + $0x8] sm:$0xff] %v2846_v51 }
 0x3d2   : > { %v2812_v22 = vpop.xlane.xlu2 %2811 }
 0x3d3   : > { %3092 = vrcp.f32 %v2812_v22  ;;  %v2838_v37 = vand.u32 2147483648, %v2812_v22  ;;  %v2836_v31 = vand.u32 2147483647, %v2812_v22  ;;  %vm2832_vm15 = vweird.f32 %v2812_v22 }
 0x3d5   : > { %v2839_v32 = vor.u32 1.1754944e-38, %v2838_v37  ;;  %vm2837_vm1 = vcmp.eq.f32.partialorder %v2836_v31, 8.507059e+37 }
 0x3d9   : > { %v3093_v46 = vpop.eup %3092 }
 0x3da   : > { %v2828_v58 = vmul.f32 %v3093_v46, %v2812_v22  ;;  %vm2833_vm14 = vweird.f32 %v3093_v46  ;;  %v466_v1 = vpop.permute.xlu2 %465 }
 0x3db   : > { %vm2834_vm0 = vmor %vm2832_vm15, %vm2833_vm14  ;;  %v502_v47 = vadd.f32 %v4154_v5, %v466_v1  ;;  %v525_v8 = vadd.f32 %v4152_v57, %v466_v1 }
 0x3dc   : > { %v2829_v14 = vsub.f32 1.0, %v2828_v58 }
 0x3de   : > { %v2830_v48 = vmul.f32 %v3093_v46, %v2829_v14 }
 0x3e0   : > { %v2831_v11 = vadd.f32 %v3093_v46, %v2830_v48 }
 0x3e2   : > { %v2835_v52 = vsel %vm2834_vm0, %v3093_v46, %v2831_v11 }
 0x3e3   : > { %v2840_v0 = vsel %vm2837_vm1, %v2839_v32, %v2835_v52 }
 0x3e4   : > { %v2843_v39 = vmul.f32 %v3087_v61, %v2840_v0  ;;  %v2844_v29 = vmul.f32 %v3089_v30, %v2840_v0 }
 0x3e6   : > { %v2847_v16 = vmul.f32 %v2843_v39, %v502_v47  ;;  %v2848_v36 = vmul.f32 %v2844_v29, %v525_v8 }
 0x3e8   : > { %2851 = vst [vmem:[%s4465_s21 + $0x10] sm:$0xff] %v2847_v16 }
 0x3e9   : > { %2852 = vst [vmem:[%s4465_s21 + $0x18] sm:$0xff] %v2848_v36 }
 0x3ea   : > { %3121 = shalt.err (!%p3118_p3)
}
 0x3eb   : > { %s3168_s17 = smov 256  }
 0x3ec   : > { %3029 = dma.vmem_to_hbm [thread:$0]  (%p3252_p5), %s2867_s20, 512, %s2869_s9, %s2854_s25, %s3168_s17, %s3168_s17, %s3160_s26  }
 0x3ed PF: > { %p3035_p4 = scmp.ge.s32.totalorder %s3156_s30, 2  ;;  %s2883_s21 = sand.u32 1, %s3144_s27  }
 0x3ee   : > { %s2884_s19 = scalar_lea.sflag [#allocation3], %s2883_s21 }
 0x3ef   : > { %p3032_p7 = pnand %p3035_p4, %p3256_p6 }
 0x3f1   : > { %p3033_p8 = pneg %p3032_p7 }
 0x3f3   : > { %3139 = dma.done.wait (%p3033_p8), %s2884_s19, 512  }
 0x3f4   : > { %3141 = vsyncadd (%p3033_p8), %s2884_s19, 4294966784  ;;  %p18_p9 = scmp.ge.s32.totalorder %s3239_s11, 4   ;;  %s4531_s27 = smov %s3148_s28 }
 0x3f5   : > { %s4532_s28 = smov %s3152_s29  ;;  %s4533_s29 = smov %s3250_s14 }
 0x3f6   : > { %s4534_s30 = smov %s3239_s11  ;;  %20 = sbr.rel (!%p18_p9) target bundleno = 3 (0x3), region = 87 }
 0x3fb   :  { %2890 = vsyncpa [#allocation3], 1 }
 0x3fc   :  { %2892 = vsyncpa [#allocation3 + $0x1], 1 }

</bundles_post_ra>
